<compile_context>
chip_gen: v7x
topology: tpu7x:2x2x1
jax: 0.10.0
libtpu: 0.0.40
codegen_flags: <defaults>
</compile_context>

<pallas_src>
import jax
import jax.numpy as jnp
from jax.experimental import pallas as pl
from jax.experimental.pallas import tpu as pltpu


def _withbias_layernorm_kernel(x_ref, o_ref):
    # x_ref / o_ref: (TILE_R, C) VMEM block; normalize each row over C.
    x = x_ref[...].astype(jnp.float32)
    inv_c = 1.0 / x.shape[-1]                      # static python scalar
    # one pass over the block: both reductions together (XLU lane reduce)
    s1 = jnp.sum(x, axis=-1, keepdims=True)
    s2 = jnp.sum(x * x, axis=-1, keepdims=True)
    mu = s1 * inv_c
    var = jnp.maximum(s2 * inv_c - mu * mu, 0.0)   # clamp cancellation negatives
    inv_std = jax.lax.rsqrt(var + 1e-5)            # EUP rsqrt; VPU broadcast mul
    o_ref[...] = ((x - mu) * inv_std).astype(o_ref.dtype)


def _pick_tile_rows(n_rows, c, itemsize, target_bytes):
    """Sublane-aligned row tile sized to ~target_bytes per block."""
    max_tr = max(8, ((target_bytes // max(1, c * itemsize)) // 8) * 8)
    if n_rows <= max_tr:
        return n_rows          # whole row extent in one block (always legal)
    return max_tr              # multiple of 8; ragged tail handled by masking


def withbias_layernorm(x, target_block_bytes=1 << 20):
    """LayerNorm (no affine) over the last dim of `x`, exactly matching the
    torch WithBias_LayerNorm.forward.  Input dtype is preserved in HBM; the
    kernel upcasts to f32 internally (so bf16 inputs keep half the traffic)."""
    orig_shape = x.shape
    C = orig_shape[-1]
    R = 1
    for d in orig_shape[:-1]:
        R *= d
    R = max(R, 1)
    x2 = x.reshape(R, C)                           # free reshape (row-major)

    tr = _pick_tile_rows(R, C, jnp.dtype(x2.dtype).itemsize, target_block_bytes)
    grid = (pl.cdiv(R, tr),)

    out2 = pl.pallas_call(
        _withbias_layernorm_kernel,
        out_shape=jax.ShapeDtypeStruct((R, C), x2.dtype),
        grid_spec=pltpu.PrefetchScalarGridSpec(
            num_scalar_prefetch=0,
            grid=grid,
            in_specs=[pl.BlockSpec((tr, C), lambda i: (i, 0))],
            out_specs=pl.BlockSpec((tr, C), lambda i: (i, 0)),
        ),
        compiler_params=pltpu.CompilerParams(
            dimension_semantics=("parallel",)),
    )(x2)
    return out2.reshape(orig_shape)


def _reference(x):
    # pure-JAX reference of the torch forward (unbiased=False variance)
    xf = x.astype(jnp.float32)
    mu = xf.mean(-1, keepdims=True)
    var = ((xf - mu) ** 2).mean(-1, keepdims=True)
    return ((xf - mu) / jnp.sqrt(var + 1e-5)).astype(x.dtype)


if __name__ == "__main__":
    key = jax.random.PRNGKey(0)
    # HTB feeds this module tensors rearranged `b c h w -> b (h w) c`;
    # small example: batch=2, h=w=16 (-> 256 tokens), channels=32.
    x = jax.random.normal(key, (2, 16 * 16, 32), dtype=jnp.float32)

    y = jax.block_until_ready(withbias_layernorm(x))

    y_ref = _reference(x)
    assert y.shape == x.shape and y.dtype == x.dtype
    assert jnp.max(jnp.abs(y - y_ref)) < 1e-4

    print("KERNEL_OK")
</pallas_src>

<mosaic_0001>
module attributes {stable_mosaic.version = 11 : i64} {
  func.func @_withbias_layernorm_kernel(%arg0: i32, %arg1: memref<512x32xf32, #tpu.memory_space<vmem>>, %arg2: memref<512x32xf32, #tpu.memory_space<vmem>>) attributes {dimension_semantics = [#tpu.dimension_semantics<parallel>], iteration_bounds = array<i64: 1>, scalar_prefetch = 0 : i64, scratch_operands = 0 : i64, tpu.core_type = #tpu.core_type<tc>, window_params = [{transform_indices = @transform_0, window_bounds = array<i64: 512, 32>}, {transform_indices = @transform_1, window_bounds = array<i64: 512, 32>}]} {
    %c0 = arith.constant 0 : index
    %c0_0 = arith.constant 0 : index
    %0 = vector.load %arg1[%c0, %c0_0] : memref<512x32xf32, #tpu.memory_space<vmem>>, vector<512x32xf32>
    %cst = arith.constant dense<0.000000e+00> : vector<512xf32>
    %1 = vector.multi_reduction <add>, %0, %cst [1] : vector<512x32xf32> to vector<512xf32>
    %2 = vector.shape_cast %1 : vector<512xf32> to vector<512x1xf32>
    %3 = arith.mulf %0, %0 : vector<512x32xf32>
    %cst_1 = arith.constant dense<0.000000e+00> : vector<512xf32>
    %4 = vector.multi_reduction <add>, %3, %cst_1 [1] : vector<512x32xf32> to vector<512xf32>
    %5 = vector.shape_cast %4 : vector<512xf32> to vector<512x1xf32>
    %cst_2 = arith.constant 3.125000e-02 : f32
    %6 = vector.broadcast %cst_2 : f32 to vector<512x1xf32>
    %7 = arith.mulf %2, %6 : vector<512x1xf32>
    %cst_3 = arith.constant 3.125000e-02 : f32
    %8 = vector.broadcast %cst_3 : f32 to vector<512x1xf32>
    %9 = arith.mulf %5, %8 : vector<512x1xf32>
    %10 = arith.mulf %7, %7 : vector<512x1xf32>
    %11 = arith.subf %9, %10 : vector<512x1xf32>
    %cst_4 = arith.constant 0.000000e+00 : f32
    %12 = vector.broadcast %cst_4 : f32 to vector<512x1xf32>
    %13 = arith.maximumf %11, %12 : vector<512x1xf32>
    %cst_5 = arith.constant 9.99999974E-6 : f32
    %14 = vector.broadcast %cst_5 : f32 to vector<512x1xf32>
    %15 = arith.addf %13, %14 : vector<512x1xf32>
    %16 = math.rsqrt %15 : vector<512x1xf32>
    %17 = vector.broadcast %7 : vector<512x1xf32> to vector<512x32xf32>
    %18 = arith.subf %0, %17 : vector<512x32xf32>
    %19 = vector.broadcast %16 : vector<512x1xf32> to vector<512x32xf32>
    %20 = arith.mulf %18, %19 : vector<512x32xf32>
    %c0_6 = arith.constant 0 : index
    %c0_7 = arith.constant 0 : index
    %21 = vector.load %arg2[%c0_6, %c0_7] : memref<512x32xf32, #tpu.memory_space<vmem>>, vector<512x32xf32>
    tpu.vector_store %arg2[%c0_6, %c0_7], %20 {strides = array<i32>} : memref<512x32xf32, #tpu.memory_space<vmem>>, vector<512x32xf32>,
    return
  }
  func.func @transform_0(%arg0: i32) -> (i32, i32) {
    %c0_i32 = arith.constant 0 : i32
    %c0_i32_0 = arith.constant 0 : i32
    return %arg0, %c0_i32 : i32, i32
  }
  func.func @transform_1(%arg0: i32) -> (i32, i32) {
    %c0_i32 = arith.constant 0 : i32
    %c0_i32_0 = arith.constant 0 : i32
    return %arg0, %c0_i32 : i32, i32
  }
}

</mosaic_0001>

<bundles_post_ra>
// kernel: tpu_custom_call.1
= control target key start
LH: loop header
LB: loop body
LE: loop exit
PB: predicated region body
PF: predicated region fallthrough
CT: control target
= control target key end

     0   :  { %vm72_vm0 = vcmask 261120   ;;  %s3276_s0 = inlined_call_operand.vmem [shape: f32[512,32], index: 0, kind: input, shape index: {}]   ;;  %s3277_s1 = inlined_call_operand.vmem [shape: f32[512,32], index: 1, kind: output, shape index: {}]  }
   0x1   :  { %v1345_v0 = vld [vmem:[%s3276_s0 + $0x10] sm:$0xff]  ;;  %v1350_v1 = vld [vmem:[%s3276_s0] sm:$0xff]  ;;  %v1355_v2 = vld [vmem:[%s3276_s0 + $0x18] sm:$0xff] }
   0x2   :  { %v79_v3 = vsel %vm72_vm0, %v1345_v0, 0.0  ;;  %v73_v4 = vsel %vm72_vm0, %v1350_v1, 0.0  ;;  %v1364_v5 = vld [vmem:[%s3276_s0 + $0x8] sm:$0xff]  ;;  %v82_v6 = vsel %vm72_vm0, %v1355_v2, 0.0  ;;  %v1378_v9 = vld [vmem:[%s3276_s0 + $0x20] sm:$0xff]  ;;  %v1387_v12 = vld [vmem:[%s3276_s0 + $0x38] sm:$0xff] }
   0x3   :  { %3339 = vst [vmem:[#allocation2_spill] sm:$0xff] %v1364_v5  ;;  %80 = vadd.xlane.f32.xlu1 %v79_v3  ;;  %74 = vadd.xlane.f32.xlu0 %v73_v4  ;;  %v76_v7 = vsel %vm72_vm0, %v1364_v5, 0.0  ;;  %v1373_v8 = vld [vmem:[%s3276_s0 + $0x28] sm:$0xff]  ;;  %v85_v11 = vsel %vm72_vm0, %v1378_v9, 0.0  ;;  %v1392_v13 = vld [vmem:[%s3276_s0 + $0x30] sm:$0xff]  ;;  %v94_v14 = vsel %vm72_vm0, %v1387_v12, 0.0 }
   0x4   :  { %v88_v10 = vsel %vm72_vm0, %v1373_v8, 0.0  ;;  %3340 = vst [vmem:[#allocation3_spill] sm:$0xff] %v1392_v13  ;;  %v91_v15 = vsel %vm72_vm0, %v1392_v13, 0.0  ;;  %v1401_v16 = vld [vmem:[%s3276_s0 + $0x48] sm:$0xff]  ;;  %v1406_v17 = vld [vmem:[%s3276_s0 + $0x40] sm:$0xff]  ;;  %v1415_v20 = vld [vmem:[%s3276_s0 + $0x58] sm:$0xff] }
   0x5   :  { %3341 = vst [vmem:[#allocation4_spill] sm:$0xff] %v1406_v17  ;;  %v100_v18 = vsel %vm72_vm0, %v1401_v16, 0.0  ;;  %v97_v19 = vsel %vm72_vm0, %v1406_v17, 0.0  ;;  %3342 = vst [vmem:[#allocation5_spill] sm:$0xff] %v1415_v20  ;;  %v1420_v21 = vld [vmem:[%s3276_s0 + $0x50] sm:$0xff]  ;;  %v106_v22 = vsel %vm72_vm0, %v1415_v20, 0.0 }
   0x6   :  { %3343 = vst [vmem:[#allocation6_spill] sm:$0xff] %v1420_v21  ;;  %v103_v23 = vsel %vm72_vm0, %v1420_v21, 0.0  ;;  %v1429_v24 = vld [vmem:[%s3276_s0 + $0x68] sm:$0xff]  ;;  %v1434_v25 = vld [vmem:[%s3276_s0 + $0x60] sm:$0xff]  ;;  %v1443_v28 = vld [vmem:[%s3276_s0 + $0x78] sm:$0xff] }
   0x7   :  { %83 = vadd.xlane.f32.xlu1 %v82_v6  ;;  %77 = vadd.xlane.f32.xlu0 %v76_v7  ;;  %3344 = vst [vmem:[#allocation7_spill] sm:$0xff] %v1429_v24  ;;  %3345 = vst [vmem:[#allocation8_spill] sm:$0xff] %v1434_v25  ;;  %v112_v26 = vsel %vm72_vm0, %v1429_v24, 0.0  ;;  %v109_v27 = vsel %vm72_vm0, %v1434_v25, 0.0  ;;  %v1448_v29 = vld [vmem:[%s3276_s0 + $0x70] sm:$0xff]  ;;  %v118_v30 = vsel %vm72_vm0, %v1443_v28, 0.0 }
   0x8   :  { %3346 = vst [vmem:[#allocation9_spill] sm:$0xff] %v1443_v28  ;;  %3347 = vst [vmem:[#allocation10_spill] sm:$0xff] %v1448_v29  ;;  %v115_v31 = vsel %vm72_vm0, %v1448_v29, 0.0  ;;  %v1457_v32 = vld [vmem:[%s3276_s0 + $0x88] sm:$0xff]  ;;  %v1462_v33 = vld [vmem:[%s3276_s0 + $0x80] sm:$0xff] }
   0x9   :  { %3348 = vst [vmem:[#allocation11_spill] sm:$0xff] %v1457_v32  ;;  %3349 = vst [vmem:[#allocation12_spill] sm:$0xff] %v1462_v33  ;;  %v124_v34 = vsel %vm72_vm0, %v1457_v32, 0.0  ;;  %v121_v35 = vsel %vm72_vm0, %v1462_v33, 0.0  ;;  %v1471_v36 = vld [vmem:[%s3276_s0 + $0x98] sm:$0xff]  ;;  %v1476_v37 = vld [vmem:[%s3276_s0 + $0x90] sm:$0xff] }
   0xa   :  { %3350 = vst [vmem:[#allocation13_spill] sm:$0xff] %v1471_v36  ;;  %3351 = vst [vmem:[#allocation14_spill] sm:$0xff] %v1476_v37  ;;  %v130_v38 = vsel %vm72_vm0, %v1471_v36, 0.0  ;;  %v127_v39 = vsel %vm72_vm0, %v1476_v37, 0.0  ;;  %v1485_v40 = vld [vmem:[%s3276_s0 + $0xa8] sm:$0xff]  ;;  %v1490_v41 = vld [vmem:[%s3276_s0 + $0xa0] sm:$0xff] }
   0xb   :  { %89 = vadd.xlane.f32.xlu1 %v88_v10  ;;  %86 = vadd.xlane.f32.xlu0 %v85_v11  ;;  %3352 = vst [vmem:[#allocation15_spill] sm:$0xff] %v1485_v40  ;;  %3353 = vst [vmem:[#allocation16_spill] sm:$0xff] %v1490_v41  ;;  %v136_v42 = vsel %vm72_vm0, %v1485_v40, 0.0  ;;  %v133_v43 = vsel %vm72_vm0, %v1490_v41, 0.0  ;;  %v1499_v44 = vld [vmem:[%s3276_s0 + $0xb8] sm:$0xff]  ;;  %v1504_v45 = vld [vmem:[%s3276_s0 + $0xb0] sm:$0xff] }
   0xc   :  { %3354 = vst [vmem:[#allocation17_spill] sm:$0xff] %v1499_v44  ;;  %3355 = vst [vmem:[#allocation18_spill] sm:$0xff] %v1504_v45  ;;  %v142_v46 = vsel %vm72_vm0, %v1499_v44, 0.0  ;;  %v139_v47 = vsel %vm72_vm0, %v1504_v45, 0.0  ;;  %v1513_v48 = vld [vmem:[%s3276_s0 + $0xc8] sm:$0xff]  ;;  %v1518_v49 = vld [vmem:[%s3276_s0 + $0xc0] sm:$0xff] }
   0xd   :  { %3356 = vst [vmem:[#allocation19_spill] sm:$0xff] %v1513_v48  ;;  %v148_v50 = vsel %vm72_vm0, %v1513_v48, 0.0  ;;  %v145_v51 = vsel %vm72_vm0, %v1518_v49, 0.0  ;;  %v1527_v52 = vld [vmem:[%s3276_s0 + $0xd8] sm:$0xff]  ;;  %v1532_v53 = vld [vmem:[%s3276_s0 + $0xd0] sm:$0xff]  ;;  %v1541_v56 = vld [vmem:[%s3276_s0 + $0xe8] sm:$0xff] }
   0xe   :  { %v154_v54 = vsel %vm72_vm0, %v1527_v52, 0.0  ;;  %v151_v55 = vsel %vm72_vm0, %v1532_v53, 0.0  ;;  %v1546_v57 = vld [vmem:[%s3276_s0 + $0xe0] sm:$0xff]  ;;  %v160_v58 = vsel %vm72_vm0, %v1541_v56, 0.0  ;;  %v1555_v60 = vld [vmem:[%s3276_s0 + $0xf8] sm:$0xff]  ;;  %v1560_v61 = vld [vmem:[%s3276_s0 + $0xf0] sm:$0xff] }
   0xf   :  { %95 = vadd.xlane.f32.xlu1 %v94_v14  ;;  %92 = vadd.xlane.f32.xlu0 %v91_v15  ;;  %v157_v59 = vsel %vm72_vm0, %v1546_v57, 0.0  ;;  %v166_v62 = vsel %vm72_vm0, %v1555_v60, 0.0  ;;  %v163_v63 = vsel %vm72_vm0, %v1560_v61, 0.0  ;;  %v1569_v3 = vld [vmem:[%s3276_s0 + $0x108] sm:$0xff]  ;;  %v1574_v4 = vld [vmem:[%s3276_s0 + $0x100] sm:$0xff]  ;;  %v1583_v10 = vld [vmem:[%s3276_s0 + $0x118] sm:$0xff] }
  0x10   :  { %v172_v6 = vsel %vm72_vm0, %v1569_v3, 0.0  ;;  %v169_v7 = vsel %vm72_vm0, %v1574_v4, 0.0  ;;  %v1588_v11 = vld [vmem:[%s3276_s0 + $0x110] sm:$0xff]  ;;  %v178_v14 = vsel %vm72_vm0, %v1583_v10, 0.0 }
  0x11   :  { %v175_v15 = vsel %vm72_vm0, %v1588_v11, 0.0 }
  0x13   :  { %101 = vadd.xlane.f32.xlu1 %v100_v18  ;;  %98 = vadd.xlane.f32.xlu0 %v97_v19  ;;  %v1597_v18 = vld [vmem:[%s3276_s0 + $0x128] sm:$0xff]  ;;  %v1602_v19 = vld [vmem:[%s3276_s0 + $0x120] sm:$0xff] }
  0x17   :  { %107 = vadd.xlane.f32.xlu1 %v106_v22  ;;  %104 = vadd.xlane.f32.xlu0 %v103_v23  ;;  %v184_v22 = vsel %vm72_vm0, %v1597_v18, 0.0  ;;  %v181_v23 = vsel %vm72_vm0, %v1602_v19, 0.0 }
  0x1b   :  { %113 = vadd.xlane.f32.xlu1 %v112_v26  ;;  %110 = vadd.xlane.f32.xlu0 %v109_v27  ;;  %v1611_v26 = vld [vmem:[%s3276_s0 + $0x138] sm:$0xff]  ;;  %v1616_v27 = vld [vmem:[%s3276_s0 + $0x130] sm:$0xff] }
  0x1f   :  { %119 = vadd.xlane.f32.xlu1 %v118_v30  ;;  %116 = vadd.xlane.f32.xlu0 %v115_v31  ;;  %v190_v30 = vsel %vm72_vm0, %v1611_v26, 0.0  ;;  %v187_v31 = vsel %vm72_vm0, %v1616_v27, 0.0 }
  0x23   :  { %125 = vadd.xlane.f32.xlu1 %v124_v34  ;;  %122 = vadd.xlane.f32.xlu0 %v121_v35  ;;  %v1625_v34 = vld [vmem:[%s3276_s0 + $0x148] sm:$0xff]  ;;  %v1630_v35 = vld [vmem:[%s3276_s0 + $0x140] sm:$0xff] }
  0x27   :  { %131 = vadd.xlane.f32.xlu1 %v130_v38  ;;  %128 = vadd.xlane.f32.xlu0 %v127_v39  ;;  %v196_v38 = vsel %vm72_vm0, %v1625_v34, 0.0  ;;  %v193_v39 = vsel %vm72_vm0, %v1630_v35, 0.0 }
  0x2b   :  { %137 = vadd.xlane.f32.xlu1 %v136_v42  ;;  %134 = vadd.xlane.f32.xlu0 %v133_v43  ;;  %v1639_v42 = vld [vmem:[%s3276_s0 + $0x158] sm:$0xff]  ;;  %v1644_v43 = vld [vmem:[%s3276_s0 + $0x150] sm:$0xff] }
  0x2f   :  { %143 = vadd.xlane.f32.xlu1 %v142_v46  ;;  %140 = vadd.xlane.f32.xlu0 %v139_v47  ;;  %v202_v46 = vsel %vm72_vm0, %v1639_v42, 0.0  ;;  %v199_v47 = vsel %vm72_vm0, %v1644_v43, 0.0 }
  0x33   :  { %149 = vadd.xlane.f32.xlu1 %v148_v50  ;;  %146 = vadd.xlane.f32.xlu0 %v145_v51  ;;  %v1653_v50 = vld [vmem:[%s3276_s0 + $0x168] sm:$0xff]  ;;  %v1658_v51 = vld [vmem:[%s3276_s0 + $0x160] sm:$0xff] }
  0x37   :  { %155 = vadd.xlane.f32.xlu1 %v154_v54  ;;  %152 = vadd.xlane.f32.xlu0 %v151_v55  ;;  %v208_v54 = vsel %vm72_vm0, %v1653_v50, 0.0  ;;  %v205_v55 = vsel %vm72_vm0, %v1658_v51, 0.0 }
  0x3b   :  { %161 = vadd.xlane.f32.xlu1 %v160_v58  ;;  %158 = vadd.xlane.f32.xlu0 %v157_v59  ;;  %v1667_v58 = vld [vmem:[%s3276_s0 + $0x178] sm:$0xff]  ;;  %v1672_v59 = vld [vmem:[%s3276_s0 + $0x170] sm:$0xff] }
  0x3f   :  { %167 = vadd.xlane.f32.xlu1 %v166_v62  ;;  %164 = vadd.xlane.f32.xlu0 %v163_v63  ;;  %v214_v62 = vsel %vm72_vm0, %v1667_v58, 0.0  ;;  %v211_v63 = vsel %vm72_vm0, %v1672_v59, 0.0 }
  0x43   :  { %173 = vadd.xlane.f32.xlu1 %v172_v6  ;;  %170 = vadd.xlane.f32.xlu0 %v169_v7  ;;  %v1681_v6 = vld [vmem:[%s3276_s0 + $0x188] sm:$0xff]  ;;  %v1686_v7 = vld [vmem:[%s3276_s0 + $0x180] sm:$0xff] }
  0x47   :  { %179 = vadd.xlane.f32.xlu1 %v178_v14  ;;  %176 = vadd.xlane.f32.xlu0 %v175_v15  ;;  %v220_v14 = vsel %vm72_vm0, %v1681_v6, 0.0  ;;  %v217_v15 = vsel %vm72_vm0, %v1686_v7, 0.0 }
  0x4b   :  { %185 = vadd.xlane.f32.xlu1 %v184_v22  ;;  %182 = vadd.xlane.f32.xlu0 %v181_v23  ;;  %v1695_v22 = vld [vmem:[%s3276_s0 + $0x198] sm:$0xff]  ;;  %v1700_v23 = vld [vmem:[%s3276_s0 + $0x190] sm:$0xff] }
  0x4f   :  { %191 = vadd.xlane.f32.xlu1 %v190_v30  ;;  %188 = vadd.xlane.f32.xlu0 %v187_v31  ;;  %v226_v30 = vsel %vm72_vm0, %v1695_v22, 0.0  ;;  %v223_v31 = vsel %vm72_vm0, %v1700_v23, 0.0 }
  0x53   :  { %197 = vadd.xlane.f32.xlu1 %v196_v38  ;;  %194 = vadd.xlane.f32.xlu0 %v193_v39  ;;  %v1709_v38 = vld [vmem:[%s3276_s0 + $0x1a8] sm:$0xff]  ;;  %v1714_v39 = vld [vmem:[%s3276_s0 + $0x1a0] sm:$0xff] }
  0x57   :  { %203 = vadd.xlane.f32.xlu1 %v202_v46  ;;  %200 = vadd.xlane.f32.xlu0 %v199_v47  ;;  %v232_v46 = vsel %vm72_vm0, %v1709_v38, 0.0  ;;  %v229_v47 = vsel %vm72_vm0, %v1714_v39, 0.0 }
  0x5b   :  { %209 = vadd.xlane.f32.xlu1 %v208_v54  ;;  %206 = vadd.xlane.f32.xlu0 %v205_v55  ;;  %v1723_v54 = vld [vmem:[%s3276_s0 + $0x1b8] sm:$0xff]  ;;  %v1728_v55 = vld [vmem:[%s3276_s0 + $0x1b0] sm:$0xff] }
  0x5c   :  { %3357 = vst [vmem:[#allocation20_spill] sm:$0xff] %v1723_v54  ;;  %3358 = vst [vmem:[#allocation21_spill] sm:$0xff] %v1728_v55 }
  0x5f   :  { %215 = vadd.xlane.f32.xlu1 %v214_v62  ;;  %212 = vadd.xlane.f32.xlu0 %v211_v63  ;;  %v238_v62 = vsel %vm72_vm0, %v1723_v54, 0.0  ;;  %v235_v63 = vsel %vm72_vm0, %v1728_v55, 0.0 }
  0x63   :  { %221 = vadd.xlane.f32.xlu1 %v220_v14  ;;  %218 = vadd.xlane.f32.xlu0 %v217_v15  ;;  %v1737_v14 = vld [vmem:[%s3276_s0 + $0x1c8] sm:$0xff]  ;;  %v1742_v15 = vld [vmem:[%s3276_s0 + $0x1c0] sm:$0xff] }
  0x64   :  { %3359 = vst [vmem:[#allocation22_spill] sm:$0xff] %v1737_v14  ;;  %3360 = vst [vmem:[#allocation23_spill] sm:$0xff] %v1742_v15 }
  0x67   :  { %227 = vadd.xlane.f32.xlu1 %v226_v30  ;;  %224 = vadd.xlane.f32.xlu0 %v223_v31  ;;  %v244_v30 = vsel %vm72_vm0, %v1737_v14, 0.0  ;;  %v241_v31 = vsel %vm72_vm0, %v1742_v15, 0.0  ;;  %v1765_v15 = vld [vmem:[%s3276_s0 + $0x1e8] sm:$0xff]  ;;  %v1770_v14 = vld [vmem:[%s3276_s0 + $0x1e0] sm:$0xff] }
  0x68   :  { %3363 = vst [vmem:[#allocation26_spill] sm:$0xff] %v1765_v15  ;;  %3364 = vst [vmem:[#allocation27_spill] sm:$0xff] %v1770_v14 }
  0x6b   :  { %233 = vadd.xlane.f32.xlu1 %v232_v46  ;;  %230 = vadd.xlane.f32.xlu0 %v229_v47  ;;  %v1751_v46 = vld [vmem:[%s3276_s0 + $0x1d8] sm:$0xff]  ;;  %v1756_v47 = vld [vmem:[%s3276_s0 + $0x1d0] sm:$0xff] }
  0x6c   :  { %3361 = vst [vmem:[#allocation24_spill] sm:$0xff] %v1751_v46  ;;  %3362 = vst [vmem:[#allocation25_spill] sm:$0xff] %v1756_v47 }
  0x6f   :  { %239 = vadd.xlane.f32.xlu1 %v238_v62  ;;  %236 = vadd.xlane.f32.xlu0 %v235_v63  ;;  %v250_v62 = vsel %vm72_vm0, %v1751_v46, 0.0  ;;  %v247_v63 = vsel %vm72_vm0, %v1756_v47, 0.0  ;;  %v1779_v47 = vld [vmem:[%s3276_s0 + $0x1f8] sm:$0xff]  ;;  %v1784_v46 = vld [vmem:[%s3276_s0 + $0x1f0] sm:$0xff] }
  0x70   :  { %3365 = vst [vmem:[#allocation28_spill] sm:$0xff] %v1784_v46 }
  0x73   :  { %245 = vadd.xlane.f32.xlu1 %v244_v30  ;;  %242 = vadd.xlane.f32.xlu0 %v241_v31  ;;  %v256_v30 = vsel %vm72_vm0, %v1765_v15, 0.0  ;;  %v253_v31 = vsel %vm72_vm0, %v1770_v14, 0.0  ;;  %v266_v14 = vmul.f32 %v1364_v5, %v1364_v5  ;;  %v265_v15 = vmul.f32 %v1350_v1, %v1350_v1 }
  0x75   :  { %v332_v55 = vsel %vm72_vm0, %v266_v14, 0.0  ;;  %v329_v54 = vsel %vm72_vm0, %v265_v15, 0.0  ;;  %v269_v14 = vmul.f32 %v1378_v9, %v1378_v9 }
  0x77   :  { %251 = vadd.xlane.f32.xlu1 %v250_v62  ;;  %248 = vadd.xlane.f32.xlu0 %v247_v63  ;;  %v262_v62 = vsel %vm72_vm0, %v1779_v47, 0.0  ;;  %v259_v63 = vsel %vm72_vm0, %v1784_v46, 0.0 }
  0x7b   :  { %257 = vadd.xlane.f32.xlu1 %v256_v30  ;;  %254 = vadd.xlane.f32.xlu0 %v253_v31  ;;  %v268_v30 = vmul.f32 %v1355_v2, %v1355_v2  ;;  %v267_v31 = vmul.f32 %v1345_v0, %v1345_v0 }
  0x7d   :  { %v338_v46 = vsel %vm72_vm0, %v268_v30, 0.0  ;;  %v335_v5 = vsel %vm72_vm0, %v267_v31, 0.0 }
  0x7f   :  { %263 = vadd.xlane.f32.xlu1 %v262_v62  ;;  %260 = vadd.xlane.f32.xlu0 %v259_v63  ;;  %v270_v62 = vmul.f32 %v1373_v8, %v1373_v8  ;;  %v341_v63 = vsel %vm72_vm0, %v269_v14, 0.0 }
  0x81   :  { %v344_v15 = vsel %vm72_vm0, %v270_v62, 0.0 }
  0x83   :  { %333 = vadd.xlane.f32.xlu1 %v332_v55  ;;  %330 = vadd.xlane.f32.xlu0 %v329_v54  ;;  %v272_v55 = vmul.f32 %v1387_v12, %v1387_v12  ;;  %v271_v54 = vmul.f32 %v1392_v13, %v1392_v13 }
  0x85   :  { %v350_v30 = vsel %vm72_vm0, %v272_v55, 0.0  ;;  %v347_v31 = vsel %vm72_vm0, %v271_v54, 0.0  ;;  %v275_v55 = vmul.f32 %v1420_v21, %v1420_v21  ;;  %v280_v21 = vmul.f32 %v1443_v28, %v1443_v28 }
  0x86   :  { %v281_v28 = vmul.f32 %v1462_v33, %v1462_v33  ;;  %v286_v33 = vmul.f32 %v1485_v40, %v1485_v40  ;;  %v287_v40 = vmul.f32 %v1504_v45, %v1504_v45  ;;  %v292_v45 = vmul.f32 %v1527_v52, %v1527_v52 }
  0x87   :  { %339 = vadd.xlane.f32.xlu1 %v338_v46  ;;  %336 = vadd.xlane.f32.xlu0 %v335_v5  ;;  %v274_v46 = vmul.f32 %v1401_v16, %v1401_v16  ;;  %v273_v5 = vmul.f32 %v1406_v17, %v1406_v17  ;;  %v278_v17 = vmul.f32 %v1429_v24, %v1429_v24 }
  0x88   :  { %v279_v24 = vmul.f32 %v1448_v29, %v1448_v29  ;;  %v284_v29 = vmul.f32 %v1471_v36, %v1471_v36  ;;  %v285_v36 = vmul.f32 %v1490_v41, %v1490_v41  ;;  %v290_v41 = vmul.f32 %v1513_v48, %v1513_v48 }
  0x89   :  { %v356_v13 = vsel %vm72_vm0, %v274_v46, 0.0  ;;  %v359_v46 = vsel %vm72_vm0, %v275_v55, 0.0  ;;  %v291_v48 = vmul.f32 %v1532_v53, %v1532_v53  ;;  %v293_v52 = vmul.f32 %v1546_v57, %v1546_v57 }
  0x8b   :  { %345 = vadd.xlane.f32.xlu1 %v344_v15  ;;  %342 = vadd.xlane.f32.xlu0 %v341_v63  ;;  %v276_v15 = vmul.f32 %v1415_v20, %v1415_v20  ;;  %v353_v63 = vsel %vm72_vm0, %v273_v5, 0.0  ;;  %v277_v20 = vmul.f32 %v1434_v25, %v1434_v25  ;;  %v282_v25 = vmul.f32 %v1457_v32, %v1457_v32 }
  0x8c   :  { %v283_v32 = vmul.f32 %v1476_v37, %v1476_v37  ;;  %v288_v37 = vmul.f32 %v1499_v44, %v1499_v44  ;;  %v289_v44 = vmul.f32 %v1518_v49, %v1518_v49 }
  0x8f   :  { %351 = vadd.xlane.f32.xlu1 %v350_v30  ;;  %348 = vadd.xlane.f32.xlu0 %v347_v31  ;;  %v362_v31 = vsel %vm72_vm0, %v276_v15, 0.0  ;;  %v365_v15 = vsel %vm72_vm0, %v277_v20, 0.0 }
  0x90   :  { %v1818_v62 = vpop.xlane.xlu1 %80  ;;  %v1820_v14 = vpop.xlane.xlu0 %74 }
  0x93   :  { %357 = vadd.xlane.f32.xlu1 %v356_v13  ;;  %354 = vadd.xlane.f32.xlu0 %v353_v63  ;;  %v368_v63 = vsel %vm72_vm0, %v278_v17, 0.0  ;;  %v371_v17 = vsel %vm72_vm0, %v279_v24, 0.0 }
  0x94   :  { %v1828_v54 = vpop.xlane.xlu1 %83  ;;  %v1830_v30 = vpop.xlane.xlu0 %77 }
  0x97   :  { %363 = vadd.xlane.f32.xlu1 %v362_v31  ;;  %360 = vadd.xlane.f32.xlu0 %v359_v46  ;;  %v374_v46 = vsel %vm72_vm0, %v280_v21, 0.0  ;;  %v377_v21 = vsel %vm72_vm0, %v281_v28, 0.0 }
  0x98   :  { %v1838_v5 = vpop.xlane.xlu1 %89  ;;  %v1840_v13 = vpop.xlane.xlu0 %86 }
  0x9b   :  { %369 = vadd.xlane.f32.xlu1 %v368_v63  ;;  %366 = vadd.xlane.f32.xlu0 %v365_v15  ;;  %v380_v15 = vsel %vm72_vm0, %v282_v25, 0.0  ;;  %v383_v25 = vsel %vm72_vm0, %v283_v32, 0.0 }
  0x9c   :  { %v1848_v55 = vpop.xlane.xlu1 %95  ;;  %v1850_v31 = vpop.xlane.xlu0 %92 }
  0x9f   :  { %375 = vadd.xlane.f32.xlu1 %v374_v46  ;;  %372 = vadd.xlane.f32.xlu0 %v371_v17  ;;  %v386_v17 = vsel %vm72_vm0, %v284_v29, 0.0  ;;  %v389_v29 = vsel %vm72_vm0, %v285_v36, 0.0 }
  0xa0   :  { %v1858_v20 = vpop.xlane.xlu1 %101  ;;  %v1860_v63 = vpop.xlane.xlu0 %98 }
  0xa3   :  { %381 = vadd.xlane.f32.xlu1 %v380_v15  ;;  %378 = vadd.xlane.f32.xlu0 %v377_v21  ;;  %v392_v21 = vsel %vm72_vm0, %v286_v33, 0.0  ;;  %v395_v33 = vsel %vm72_vm0, %v287_v40, 0.0 }
  0xa4   :  { %v1868_v24 = vpop.xlane.xlu1 %107  ;;  %v1870_v46 = vpop.xlane.xlu0 %104 }
  0xa7   :  { %387 = vadd.xlane.f32.xlu1 %v386_v17  ;;  %384 = vadd.xlane.f32.xlu0 %v383_v25  ;;  %v398_v25 = vsel %vm72_vm0, %v288_v37, 0.0  ;;  %v401_v37 = vsel %vm72_vm0, %v289_v44, 0.0 }
  0xa8   :  { %v1878_v28 = vpop.xlane.xlu1 %113  ;;  %v1880_v15 = vpop.xlane.xlu0 %110 }
  0xab   :  { %393 = vadd.xlane.f32.xlu1 %v392_v21  ;;  %390 = vadd.xlane.f32.xlu0 %v389_v29  ;;  %v404_v29 = vsel %vm72_vm0, %v290_v41, 0.0  ;;  %v407_v41 = vsel %vm72_vm0, %v291_v48, 0.0 }
  0xac   :  { %v1888_v32 = vpop.xlane.xlu1 %119  ;;  %v1890_v17 = vpop.xlane.xlu0 %116 }
  0xaf   :  { %399 = vadd.xlane.f32.xlu1 %v398_v25  ;;  %396 = vadd.xlane.f32.xlu0 %v395_v33  ;;  %v410_v25 = vsel %vm72_vm0, %v292_v45, 0.0  ;;  %v294_v33 = vmul.f32 %v1541_v56, %v1541_v56  ;;  %v413_v45 = vsel %vm72_vm0, %v293_v52, 0.0  ;;  %v295_v56 = vmul.f32 %v1560_v61, %v1560_v61 }
  0xb0   :  { %v1898_v36 = vpop.xlane.xlu1 %125  ;;  %v1900_v21 = vpop.xlane.xlu0 %122 }
  0xb3   :  { %405 = vadd.xlane.f32.xlu1 %v404_v29  ;;  %402 = vadd.xlane.f32.xlu0 %v401_v37  ;;  %v416_v29 = vsel %vm72_vm0, %v294_v33, 0.0  ;;  %v296_v37 = vmul.f32 %v1555_v60, %v1555_v60  ;;  %v419_v33 = vsel %vm72_vm0, %v295_v56, 0.0  ;;  %v297_v60 = vmul.f32 %v1574_v4, %v1574_v4 }
  0xb4   :  { %v1908_v40 = vpop.xlane.xlu1 %131  ;;  %v1910_v49 = vpop.xlane.xlu0 %128 }
  0xb7   :  { %411 = vadd.xlane.f32.xlu1 %v410_v25  ;;  %408 = vadd.xlane.f32.xlu0 %v407_v41  ;;  %v422_v25 = vsel %vm72_vm0, %v296_v37, 0.0  ;;  %v298_v41 = vmul.f32 %v1569_v3, %v1569_v3  ;;  %v425_v37 = vsel %vm72_vm0, %v297_v60, 0.0  ;;  %v299_v3 = vmul.f32 %v1588_v11, %v1588_v11 }
  0xb8   :  { %v1918_v44 = vpop.xlane.xlu1 %137  ;;  %v1920_v53 = vpop.xlane.xlu0 %134 }
  0xbb   :  { %417 = vadd.xlane.f32.xlu1 %v416_v29  ;;  %414 = vadd.xlane.f32.xlu0 %v413_v45  ;;  %v428_v29 = vsel %vm72_vm0, %v298_v41, 0.0  ;;  %v300_v45 = vmul.f32 %v1583_v10, %v1583_v10  ;;  %v431_v41 = vsel %vm72_vm0, %v299_v3, 0.0  ;;  %v301_v10 = vmul.f32 %v1602_v19, %v1602_v19 }
  0xbc   :  { %v1928_v48 = vpop.xlane.xlu1 %143  ;;  %v1930_v57 = vpop.xlane.xlu0 %140 }
  0xbf   :  { %423 = vadd.xlane.f32.xlu1 %v422_v25  ;;  %420 = vadd.xlane.f32.xlu0 %v419_v33  ;;  %v434_v25 = vsel %vm72_vm0, %v300_v45, 0.0  ;;  %v302_v33 = vmul.f32 %v1597_v18, %v1597_v18  ;;  %v437_v45 = vsel %vm72_vm0, %v301_v10, 0.0  ;;  %v303_v18 = vmul.f32 %v1616_v27, %v1616_v27 }
  0xc0   :  { %v1938_v52 = vpop.xlane.xlu1 %149  ;;  %v1940_v61 = vpop.xlane.xlu0 %146 }
  0xc3   :  { %429 = vadd.xlane.f32.xlu1 %v428_v29  ;;  %426 = vadd.xlane.f32.xlu0 %v425_v37  ;;  %v440_v29 = vsel %vm72_vm0, %v302_v33, 0.0  ;;  %v304_v37 = vmul.f32 %v1611_v26, %v1611_v26  ;;  %v443_v33 = vsel %vm72_vm0, %v303_v18, 0.0  ;;  %v305_v26 = vmul.f32 %v1630_v35, %v1630_v35 }
  0xc4   :  { %v1948_v56 = vpop.xlane.xlu1 %155  ;;  %v1950_v4 = vpop.xlane.xlu0 %152 }
  0xc7   :  { %435 = vadd.xlane.f32.xlu1 %v434_v25  ;;  %432 = vadd.xlane.f32.xlu0 %v431_v41  ;;  %v446_v25 = vsel %vm72_vm0, %v304_v37, 0.0  ;;  %v306_v41 = vmul.f32 %v1625_v34, %v1625_v34  ;;  %v449_v37 = vsel %vm72_vm0, %v305_v26, 0.0  ;;  %v307_v34 = vmul.f32 %v1644_v43, %v1644_v43 }
  0xc8   :  { %v1958_v60 = vpop.xlane.xlu1 %161  ;;  %v1960_v11 = vpop.xlane.xlu0 %158 }
  0xcb   :  { %441 = vadd.xlane.f32.xlu1 %v440_v29  ;;  %438 = vadd.xlane.f32.xlu0 %v437_v45  ;;  %v452_v29 = vsel %vm72_vm0, %v306_v41, 0.0  ;;  %v308_v45 = vmul.f32 %v1639_v42, %v1639_v42  ;;  %v455_v41 = vsel %vm72_vm0, %v307_v34, 0.0  ;;  %v309_v42 = vmul.f32 %v1658_v51, %v1658_v51 }
  0xcc   :  { %v1968_v3 = vpop.xlane.xlu1 %167  ;;  %v1970_v19 = vpop.xlane.xlu0 %164 }
  0xcf   :  { %447 = vadd.xlane.f32.xlu1 %v446_v25  ;;  %444 = vadd.xlane.f32.xlu0 %v443_v33  ;;  %v458_v25 = vsel %vm72_vm0, %v308_v45, 0.0  ;;  %v310_v33 = vmul.f32 %v1653_v50, %v1653_v50  ;;  %v461_v45 = vsel %vm72_vm0, %v309_v42, 0.0  ;;  %v311_v50 = vmul.f32 %v1672_v59, %v1672_v59 }
  0xd0   :  { %v1978_v10 = vpop.xlane.xlu1 %173  ;;  %v1980_v27 = vpop.xlane.xlu0 %170 }
  0xd1   :  { %3366 = vst [vmem:[#allocation29_spill] sm:$0xff] %v1978_v10  ;;  %3367 = vst [vmem:[#allocation30_spill] sm:$0xff] %v1980_v27 }
  0xd3   :  { %453 = vadd.xlane.f32.xlu1 %v452_v29  ;;  %450 = vadd.xlane.f32.xlu0 %v449_v37  ;;  %v464_v29 = vsel %vm72_vm0, %v310_v33, 0.0  ;;  %v312_v37 = vmul.f32 %v1667_v58, %v1667_v58  ;;  %v467_v33 = vsel %vm72_vm0, %v311_v50, 0.0  ;;  %v313_v58 = vmul.f32 %v1686_v7, %v1686_v7 }
  0xd4   :  { %v1988_v18 = vpop.xlane.xlu1 %179  ;;  %v1990_v35 = vpop.xlane.xlu0 %176 }
  0xd5   :  { %3368 = vst [vmem:[#allocation31_spill] sm:$0xff] %v1988_v18  ;;  %3369 = vst [vmem:[#allocation32_spill] sm:$0xff] %v1990_v35  ;;  %v2227_v35 = vmul.f32 0.03125, %v1898_v36 }
  0xd7   :  { %459 = vadd.xlane.f32.xlu1 %v458_v25  ;;  %456 = vadd.xlane.f32.xlu0 %v455_v41  ;;  %v470_v25 = vsel %vm72_vm0, %v312_v37, 0.0  ;;  %v314_v41 = vmul.f32 %v1681_v6, %v1681_v6  ;;  %v473_v37 = vsel %vm72_vm0, %v313_v58, 0.0  ;;  %v315_v6 = vmul.f32 %v1700_v23, %v1700_v23  ;;  %3420 = vst [vmem:[#allocation58_spill] sm:$0xff] %v2227_v35 }
  0xd8   :  { %v1998_v26 = vpop.xlane.xlu1 %185  ;;  %v2000_v43 = vpop.xlane.xlu0 %182 }
  0xd9   :  { %3370 = vst [vmem:[#allocation33_spill] sm:$0xff] %v1998_v26  ;;  %3371 = vst [vmem:[#allocation34_spill] sm:$0xff] %v2000_v43  ;;  %v2246_v43 = vmul.f32 0.03125, %v1900_v21  ;;  %v2264_v21 = vmul.f32 0.03125, %v1910_v49 }
  0xdb   :  { %465 = vadd.xlane.f32.xlu1 %v464_v29  ;;  %462 = vadd.xlane.f32.xlu0 %v461_v45  ;;  %v476_v29 = vsel %vm72_vm0, %v314_v41, 0.0  ;;  %v316_v45 = vmul.f32 %v1695_v22, %v1695_v22  ;;  %v479_v41 = vsel %vm72_vm0, %v315_v6, 0.0  ;;  %v317_v22 = vmul.f32 %v1714_v39, %v1714_v39  ;;  %3423 = vst [vmem:[#allocation59_spill] sm:$0xff] %v2246_v43 }
  0xdc   :  { %v2008_v34 = vpop.xlane.xlu1 %191  ;;  %v2010_v51 = vpop.xlane.xlu0 %188 }
  0xdd   :  { %3372 = vst [vmem:[#allocation35_spill] sm:$0xff] %v2008_v34  ;;  %3373 = vst [vmem:[#allocation36_spill] sm:$0xff] %v2010_v51  ;;  %v2216_v34 = vmul.f32 0.03125, %v1890_v17 }
  0xdf   :  { %471 = vadd.xlane.f32.xlu1 %v470_v25  ;;  %468 = vadd.xlane.f32.xlu0 %v467_v33  ;;  %v482_v25 = vsel %vm72_vm0, %v316_v45, 0.0  ;;  %v318_v33 = vmul.f32 %v1709_v38, %v1709_v38  ;;  %v485_v45 = vsel %vm72_vm0, %v317_v22, 0.0  ;;  %3417 = vst [vmem:[#allocation57_spill] sm:$0xff] %v2216_v34 }
  0xe0   :  { %v2018_v42 = vpop.xlane.xlu1 %197  ;;  %v2020_v59 = vpop.xlane.xlu0 %194 }
  0xe1   :  { %3374 = vst [vmem:[#allocation37_spill] sm:$0xff] %v2018_v42  ;;  %3375 = vst [vmem:[#allocation38_spill] sm:$0xff] %v2020_v59  ;;  %v2191_v59 = vmul.f32 0.03125, %v1878_v28 }
  0xe3   :  { %477 = vadd.xlane.f32.xlu1 %v476_v29  ;;  %474 = vadd.xlane.f32.xlu0 %v473_v37  ;;  %v488_v29 = vsel %vm72_vm0, %v318_v33, 0.0  ;;  %v3380_v37 = vld [vmem:[#allocation20_spill] sm:$0xff]  ;;  %v2231_v27 = vmul.f32 %v2191_v59, %v2191_v59 }
  0xe4   :  { %v2028_v50 = vpop.xlane.xlu1 %203  ;;  %v2030_v7 = vpop.xlane.xlu0 %200 }
  0xe5   :  { %3376 = vst [vmem:[#allocation39_spill] sm:$0xff] %v2028_v50  ;;  %3377 = vst [vmem:[#allocation40_spill] sm:$0xff] %v2030_v7  ;;  %v320_v7 = vmul.f32 %v3380_v37, %v3380_v37  ;;  %v3381_v50 = vld [vmem:[#allocation21_spill] sm:$0xff] }
  0xe6   :  { %v319_v38 = vmul.f32 %v3381_v50, %v3381_v50 }
  0xe7   :  { %483 = vadd.xlane.f32.xlu1 %v482_v25  ;;  %480 = vadd.xlane.f32.xlu0 %v479_v41  ;;  %v494_v25 = vsel %vm72_vm0, %v320_v7, 0.0  ;;  %v3384_v41 = vld [vmem:[#allocation22_spill] sm:$0xff] }
  0xe8   :  { %v2038_v58 = vpop.xlane.xlu1 %209  ;;  %v2040_v23 = vpop.xlane.xlu0 %206  ;;  %v491_v33 = vsel %vm72_vm0, %v319_v38, 0.0 }
  0xe9   :  { %3378 = vst [vmem:[#allocation41_spill] sm:$0xff] %v2038_v58  ;;  %3379 = vst [vmem:[#allocation42_spill] sm:$0xff] %v2040_v23  ;;  %v322_v23 = vmul.f32 %v3384_v41, %v3384_v41  ;;  %v3385_v58 = vld [vmem:[#allocation23_spill] sm:$0xff] }
  0xea   :  { %v321_v37 = vmul.f32 %v3385_v58, %v3385_v58 }
  0xeb   :  { %489 = vadd.xlane.f32.xlu1 %v488_v29  ;;  %486 = vadd.xlane.f32.xlu0 %v485_v45  ;;  %v500_v29 = vsel %vm72_vm0, %v322_v23, 0.0  ;;  %v3388_v45 = vld [vmem:[#allocation24_spill] sm:$0xff] }
  0xec   :  { %v2048_v6 = vpop.xlane.xlu1 %215  ;;  %v2050_v39 = vpop.xlane.xlu0 %212  ;;  %v497_v7 = vsel %vm72_vm0, %v321_v37, 0.0 }
  0xed   :  { %3382 = vst [vmem:[#allocation20_spill] sm:$0xff] %v2048_v6  ;;  %3383 = vst [vmem:[#allocation21_spill] sm:$0xff] %v2050_v39  ;;  %v324_v39 = vmul.f32 %v3388_v45, %v3388_v45  ;;  %v3389_v6 = vld [vmem:[#allocation25_spill] sm:$0xff] }
  0xee   :  { %v323_v41 = vmul.f32 %v3389_v6, %v3389_v6 }
  0xef   :  { %495 = vadd.xlane.f32.xlu1 %v494_v25  ;;  %492 = vadd.xlane.f32.xlu0 %v491_v33  ;;  %v506_v25 = vsel %vm72_vm0, %v324_v39, 0.0  ;;  %v3392_v33 = vld [vmem:[#allocation26_spill] sm:$0xff] }
  0xf0   :  { %v2058_v22 = vpop.xlane.xlu1 %221  ;;  %v2060_v50 = vpop.xlane.xlu0 %218  ;;  %v503_v23 = vsel %vm72_vm0, %v323_v41, 0.0 }
  0xf1   :  { %3386 = vst [vmem:[#allocation22_spill] sm:$0xff] %v2058_v22  ;;  %3387 = vst [vmem:[#allocation23_spill] sm:$0xff] %v2060_v50  ;;  %v326_v50 = vmul.f32 %v3392_v33, %v3392_v33  ;;  %v3393_v22 = vld [vmem:[#allocation27_spill] sm:$0xff] }
  0xf2   :  { %v325_v45 = vmul.f32 %v3393_v22, %v3393_v22 }
  0xf3   :  { %501 = vadd.xlane.f32.xlu1 %v500_v29  ;;  %498 = vadd.xlane.f32.xlu0 %v497_v7  ;;  %v512_v29 = vsel %vm72_vm0, %v326_v50, 0.0  ;;  %v328_v7 = vmul.f32 %v1779_v47, %v1779_v47 }
  0xf4   :  { %v2068_v38 = vpop.xlane.xlu1 %227  ;;  %v2070_v58 = vpop.xlane.xlu0 %224  ;;  %v509_v39 = vsel %vm72_vm0, %v325_v45, 0.0  ;;  %v2099_v45 = vmul.f32 0.03125, %v1818_v62 }
  0xf5   :  { %3390 = vst [vmem:[#allocation24_spill] sm:$0xff] %v2068_v38  ;;  %3391 = vst [vmem:[#allocation25_spill] sm:$0xff] %v2070_v58  ;;  %v3396_v58 = vld [vmem:[#allocation28_spill] sm:$0xff] }
  0xf6   :  { %v327_v33 = vmul.f32 %v3396_v58, %v3396_v58  ;;  %v2119_v62 = vmul.f32 %v2099_v45, %v2099_v45 }
  0xf7   :  { %507 = vadd.xlane.f32.xlu1 %v506_v25  ;;  %504 = vadd.xlane.f32.xlu0 %v503_v23  ;;  %v518_v25 = vsel %vm72_vm0, %v328_v7, 0.0  ;;  %v2109_v7 = vmul.f32 0.03125, %v1828_v54 }
  0xf8   :  { %v2078_v37 = vpop.xlane.xlu1 %233  ;;  %v2080_v6 = vpop.xlane.xlu0 %230  ;;  %v515_v23 = vsel %vm72_vm0, %v327_v33, 0.0  ;;  %v2112_v33 = vmul.f32 0.03125, %v1830_v30 }
  0xf9   :  { %3394 = vst [vmem:[#allocation26_spill] sm:$0xff] %v2078_v37  ;;  %3395 = vst [vmem:[#allocation27_spill] sm:$0xff] %v2080_v6  ;;  %v2176_v6 = vmul.f32 0.03125, %v1870_v46 }
  0xfb   :  { %513 = vadd.xlane.f32.xlu1 %v512_v29  ;;  %510 = vadd.xlane.f32.xlu0 %v509_v39  ;;  %v2106_v39 = vmul.f32 0.03125, %v1820_v14  ;;  %v2127_v14 = vmul.f32 0.03125, %v1848_v55  ;;  %v2163_v55 = vmul.f32 0.03125, %v1868_v24  ;;  %3409 = vst [vmem:[#allocation52_spill] sm:$0xff] %v2176_v6  ;;  %v2203_v24 = vmul.f32 0.03125, %v1888_v32 }
  0xfc   :  { %v2088_v41 = vpop.xlane.xlu1 %239  ;;  %v2090_v22 = vpop.xlane.xlu0 %236  ;;  %v2222_v32 = vmul.f32 %v2176_v6, %v2176_v6  ;;  %v2258_v6 = vmul.f32 %v2227_v35, %v2227_v35  ;;  %v2287_v35 = vmul.f32 %v2264_v21, %v2264_v21 }
  0xfd   :  { %3397 = vst [vmem:[#allocation28_spill] sm:$0xff] %v2088_v41  ;;  %3398 = vst [vmem:[#allocation43_spill] sm:$0xff] %v2090_v22  ;;  %v2160_v22 = vmul.f32 0.03125, %v1860_v63  ;;  %v2213_v51 = vmul.f32 %v2163_v55, %v2163_v55  ;;  %v2243_v36 = vmul.f32 %v2203_v24, %v2203_v24 }
  0xfe   :  { %3408 = vst [vmem:[#allocation51_spill] sm:$0xff] %v2163_v55  ;;  %3415 = vst [vmem:[#allocation56_spill] sm:$0xff] %v2203_v24 }
  0xff   :  { %519 = vadd.xlane.f32.xlu1 %v518_v25  ;;  %516 = vadd.xlane.f32.xlu0 %v515_v23  ;;  %v2115_v25 = vmul.f32 0.03125, %v1838_v5  ;;  %v649_v5 = vmul.f32 %v2106_v39, %v2106_v39  ;;  %v650_v23 = vmul.f32 %v2112_v33, %v2112_v33  ;;  %3407 = vst [vmem:[#allocation50_spill] sm:$0xff] %v2160_v22 }
 0x100   :  { %v2094_v50 = vpop.xlane.xlu1 %245  ;;  %v2096_v47 = vpop.xlane.xlu0 %242  ;;  %v2207_v42 = vmul.f32 %v2160_v22, %v2160_v22 }
 0x101   :  { %3399 = vst [vmem:[#allocation44_spill] sm:$0xff] %v2094_v50  ;;  %3400 = vst [vmem:[#allocation45_spill] sm:$0xff] %v2096_v47  ;;  %v2139_v47 = vmul.f32 %v2109_v7, %v2109_v7  ;;  %v2151_v50 = vmul.f32 0.03125, %v1858_v20  ;;  %v3412_v20 = vld [vmem:[#allocation3_spill] sm:$0xff] }
 0x102   :  { %3413 = vst [vmem:[#allocation3_spill] sm:$0xff] %v2191_v59 }
 0x103   :  { %v2195_v46 = vmul.f32 %v2151_v50, %v2151_v50 }
 0x104   :  { %v2101_v58 = vpop.xlane.xlu1 %251  ;;  %v2103_v29 = vpop.xlane.xlu0 %248 }
 0x105   :  { %3401 = vst [vmem:[#allocation46_spill] sm:$0xff] %v2101_v58  ;;  %3402 = vst [vmem:[#allocation47_spill] sm:$0xff] %v2103_v29  ;;  %v2124_v29 = vmul.f32 0.03125, %v1840_v13  ;;  %v2142_v13 = vmul.f32 0.03125, %v1850_v31  ;;  %v2155_v58 = vmul.f32 %v2115_v25, %v2115_v25 }
 0x107   :  { %v2167_v41 = vmul.f32 %v2124_v29, %v2124_v29  ;;  %v2186_v37 = vmul.f32 %v2142_v13, %v2142_v13 }
 0x108   :  { %v2129_v54 = vpop.xlane.xlu1 %257  ;;  %v2131_v30 = vpop.xlane.xlu0 %254 }
 0x109   :  { %3403 = vst [vmem:[#allocation48_spill] sm:$0xff] %v2129_v54  ;;  %3404 = vst [vmem:[#allocation49_spill] sm:$0xff] %v2131_v30  ;;  %v3405_v30 = vld [vmem:[#allocation2_spill] sm:$0xff]  ;;  %v2173_v54 = vmul.f32 %v2127_v14, %v2127_v14 }
 0x10a   :  { %3406 = vst [vmem:[#allocation2_spill] sm:$0xff] %v2151_v50 }
 0x10c   :  { %v2178_v31 = vpop.xlane.xlu1 %263  ;;  %v2180_v63 = vpop.xlane.xlu0 %260 }
 0x10d   :  { %3410 = vst [vmem:[#allocation53_spill] sm:$0xff] %v2178_v31  ;;  %3411 = vst [vmem:[#allocation54_spill] sm:$0xff] %v2180_v63  ;;  %v2200_v31 = vmul.f32 0.03125, %v1880_v15 }
 0x10f   :  { %3414 = vst [vmem:[#allocation55_spill] sm:$0xff] %v2200_v31  ;;  %v2237_v15 = vmul.f32 %v2200_v31, %v2200_v31  ;;  %v2261_v31 = vmul.f32 0.03125, %v1908_v40 }
 0x110   :  { %v334_v38 = vpop.xlane.xlu1 %333  ;;  %v331_v18 = vpop.xlane.xlu0 %330 }
 0x111   :  { %v586_v63 = vmul.f32 0.03125, %v334_v38  ;;  %v585_v55 = vmul.f32 0.03125, %v331_v18  ;;  %v2252_v18 = vmul.f32 %v2216_v34, %v2216_v34  ;;  %3426 = vst [vmem:[#allocation60_spill] sm:$0xff] %v2261_v31  ;;  %v2275_v34 = vmul.f32 0.03125, %v1918_v44 }
 0x112   :  { %v2290_v44 = vmul.f32 0.03125, %v1920_v53 }
 0x113   :  { %v714_v38 = vsub.f32 %v586_v63, %v650_v23  ;;  %v713_v10 = vsub.f32 %v585_v55, %v649_v5  ;;  %v3427_v5 = vld [vmem:[#allocation11_spill] sm:$0xff]  ;;  %v2270_v63 = vmul.f32 %v2246_v43, %v2246_v43  ;;  %v2296_v43 = vmul.f32 %v2275_v34, %v2275_v34 }
 0x114   :  { %v340_v28 = vpop.xlane.xlu1 %339  ;;  %v337_v24 = vpop.xlane.xlu0 %336  ;;  %3429 = vst [vmem:[#allocation11_spill] sm:$0xff] %v2275_v34  ;;  %3431 = vst [vmem:[#allocation61_spill] sm:$0xff] %v2290_v44 }
 0x115   :  { %v778_v22 = vmax.f32 %v714_v38, 0.0  ;;  %v777_v26 = vmax.f32 %v713_v10, 0.0  ;;  %v588_v50 = vmul.f32 0.03125, %v340_v28  ;;  %v587_v23 = vmul.f32 0.03125, %v337_v24 }
 0x116   :  { %v2281_v24 = vmul.f32 %v2261_v31, %v2261_v31  ;;  %v2299_v31 = vmul.f32 0.03125, %v1928_v48 }
 0x117   :  { %v842_v49 = vadd.f32 1e-05, %v778_v22  ;;  %v841_v59 = vadd.f32 1e-05, %v777_v26  ;;  %v716_v38 = vsub.f32 %v588_v50, %v2139_v47  ;;  %v715_v10 = vsub.f32 %v587_v23, %v2119_v62  ;;  %v3432_v23 = vld [vmem:[#allocation14_spill] sm:$0xff] }
 0x118   :  { %v346_v22 = vpop.xlane.xlu1 %345  ;;  %v343_v26 = vpop.xlane.xlu0 %342  ;;  %3433 = vst [vmem:[#allocation14_spill] sm:$0xff] %v2299_v31 }
 0x119   :  { %1165 = vrsqrt.f32 %v842_v49  ;;  %v780_v50 = vmax.f32 %v716_v38, 0.0  ;;  %v779_v47 = vmax.f32 %v715_v10, 0.0  ;;  %v590_v62 = vmul.f32 0.03125, %v346_v22 }
 0x11a   :  { %1167 = vrsqrt.f32 %v841_v59  ;;  %v589_v55 = vmul.f32 0.03125, %v343_v26  ;;  %v2306_v10 = vmul.f32 %v2290_v44, %v2290_v44  ;;  %v2309_v22 = vmul.f32 0.03125, %v1930_v57 }
 0x11b   :  { %v844_v53 = vadd.f32 1e-05, %v780_v50  ;;  %v843_v28 = vadd.f32 1e-05, %v779_v47  ;;  %v718_v17 = vsub.f32 %v590_v62, %v2155_v58  ;;  %v3436_v58 = vld [vmem:[#allocation16_spill] sm:$0xff]  ;;  %v2315_v38 = vmul.f32 0.03125, %v1938_v52 }
 0x11c   :  { %3435 = vst [vmem:[#allocation62_spill] sm:$0xff] %v2309_v22  ;;  %v717_v59 = vsub.f32 %v589_v55, %v2167_v41  ;;  %v352_v26 = vpop.xlane.xlu1 %351  ;;  %v349_v40 = vpop.xlane.xlu0 %348  ;;  %v2319_v57 = vmul.f32 %v2299_v31, %v2299_v31  ;;  %v2330_v52 = vmul.f32 0.03125, %v1940_v61  ;;  %v2339_v61 = vmul.f32 0.03125, %v1948_v56 }
 0x11d   :  { %1169 = vrsqrt.f32 %v844_v53  ;;  %v782_v48 = vmax.f32 %v718_v17, 0.0  ;;  %v592_v50 = vmul.f32 0.03125, %v352_v26  ;;  %v591_v47 = vmul.f32 0.03125, %v349_v40  ;;  %v3437_v17 = vld [vmem:[#allocation17_spill] sm:$0xff] }
 0x11e   :  { %1171 = vrsqrt.f32 %v843_v28  ;;  %v781_v34 = vmax.f32 %v717_v59, 0.0  ;;  %v2327_v53 = vmul.f32 %v2309_v22, %v2309_v22 }
 0x11f   :  { %v846_v49 = vadd.f32 1e-05, %v782_v48  ;;  %v720_v41 = vsub.f32 %v592_v50, %v2173_v54  ;;  %v719_v55 = vsub.f32 %v591_v47, %v2186_v37  ;;  %v2336_v50 = vmul.f32 %v2315_v38, %v2315_v38 }
 0x120   :  { %v845_v28 = vadd.f32 1e-05, %v781_v34  ;;  %v358_v59 = vpop.xlane.xlu1 %357  ;;  %v355_v44 = vpop.xlane.xlu0 %354  ;;  %v2346_v37 = vmul.f32 %v2330_v52, %v2330_v52 }
 0x121   :  { %1173 = vrsqrt.f32 %v846_v49  ;;  %v784_v26 = vmax.f32 %v720_v41, 0.0  ;;  %v783_v62 = vmax.f32 %v719_v55, 0.0  ;;  %v594_v48 = vmul.f32 0.03125, %v358_v59  ;;  %v3439_v55 = vld [vmem:[#allocation19_spill] sm:$0xff]  ;;  %v2358_v59 = vld [vmem:[%s3276_s0 + $0xc0] sm:$0xff] }
 0x122   :  { %1175 = vrsqrt.f32 %v845_v28  ;;  %v593_v47 = vmul.f32 0.03125, %v355_v44  ;;  %v3440_v28 = vsub.f32 %v3405_v30, %v2112_v33  ;;  %v2368_v30 = vmul.f32 %v2339_v61, %v2339_v61  ;;  %v3494_v33 = vld [vmem:[#allocation37_spill] sm:$0xff] }
 0x123   :  { %v1166_v40 = vpop.eup %1165  ;;  %v848_v34 = vadd.f32 1e-05, %v784_v26  ;;  %v847_v31 = vadd.f32 1e-05, %v783_v62  ;;  %v722_v49 = vsub.f32 %v594_v48, %v2195_v46  ;;  %v3441_v62 = vsub.f32 %v1350_v1, %v2106_v39 }
 0x124   :  { %v1168_v41 = vpop.eup %1167  ;;  %v1034_v44 = vmul.f32 %v1166_v40, %v3440_v28  ;;  %v721_v22 = vsub.f32 %v593_v47, %v2207_v42  ;;  %v364_v56 = vpop.xlane.xlu1 %363  ;;  %v2371_v40 = vmul.f32 0.03125, %v1950_v4  ;;  %v3442_v4 = vsub.f32 %v1355_v2, %v2109_v7 }
 0x125   :  { %v1033_v26 = vmul.f32 %v1168_v41, %v3441_v62  ;;  %1177 = vrsqrt.f32 %v848_v34  ;;  %v786_v46 = vmax.f32 %v722_v49, 0.0  ;;  %v596_v48 = vmul.f32 0.03125, %v364_v56  ;;  %v361_v54 = vpop.xlane.xlu0 %360 }
 0x126   :  { %1098 = vst.msk [vmem:[%s3277_s1 + $0x8] sm:$0xff] %vm72_vm0, %v1034_v44  ;;  %1179 = vrsqrt.f32 %v847_v31  ;;  %v785_v1 = vmax.f32 %v721_v22, 0.0  ;;  %v595_v42 = vmul.f32 0.03125, %v361_v54  ;;  %v2381_v31 = vld [vmem:[%s3276_s0 + $0xd8] sm:$0xff] }
 0x127   :  { %v1170_v39 = vpop.eup %1169  ;;  %1097 = vst.msk [vmem:[%s3277_s1] sm:$0xff] %vm72_vm0, %v1033_v26  ;;  %v850_v47 = vadd.f32 1e-05, %v786_v46  ;;  %v724_v34 = vsub.f32 %v596_v48, %v2213_v51  ;;  %v3443_v51 = vsub.f32 %v1345_v0, %v2099_v45  ;;  %v2393_v48 = vmul.f32 0.03125, %v1958_v60  ;;  %v2406_v45 = vld [vmem:[%s3276_s0 + $0xd0] sm:$0xff]  ;;  %v3475_v60 = vld [vmem:[#allocation33_spill] sm:$0xff] }
 0x128   :  { %v1172_v49 = vpop.eup %1171  ;;  %v1036_v54 = vmul.f32 %v1170_v39, %v3442_v4  ;;  %v849_v41 = vadd.f32 1e-05, %v785_v1  ;;  %v723_v28 = vsub.f32 %v595_v42, %v2222_v32  ;;  %v370_v44 = vpop.xlane.xlu1 %369  ;;  %v2401_v0 = vmul.f32 %v2371_v40, %v2371_v40 }
 0x129   :  { %v1035_v56 = vmul.f32 %v1172_v49, %v3443_v51  ;;  %1181 = vrsqrt.f32 %v850_v47  ;;  %v788_v62 = vmax.f32 %v724_v34, 0.0  ;;  %v598_v26 = vmul.f32 0.03125, %v370_v44  ;;  %v367_v46 = vpop.xlane.xlu0 %366 }
 0x12a   :  { %1100 = vst.msk [vmem:[%s3277_s1 + $0x18] sm:$0xff] %vm72_vm0, %v1036_v54  ;;  %1183 = vrsqrt.f32 %v849_v41  ;;  %v787_v2 = vmax.f32 %v723_v28, 0.0  ;;  %v597_v7 = vmul.f32 0.03125, %v367_v46  ;;  %v2416_v47 = vmul.f32 0.03125, %v1960_v11 }
 0x12b   :  { %v1174_v32 = vpop.eup %1173  ;;  %1099 = vst.msk [vmem:[%s3277_s1 + $0x10] sm:$0xff] %vm72_vm0, %v1035_v56  ;;  %v852_v1 = vadd.f32 1e-05, %v788_v62  ;;  %v726_v42 = vsub.f32 %v598_v26, %v2231_v27  ;;  %v3444_v34 = vsub.f32 %v1373_v8, %v2115_v25  ;;  %v3445_v28 = vsub.f32 %v1378_v9, %v2124_v29  ;;  %v2436_v9 = vld [vmem:[%s3276_s0 + $0xe8] sm:$0xff] }
 0x12c   :  { %v1176_v39 = vpop.eup %1175  ;;  %v851_v4 = vadd.f32 1e-05, %v787_v2  ;;  %v725_v54 = vsub.f32 %v597_v7, %v2237_v15  ;;  %v376_v41 = vpop.xlane.xlu1 %375  ;;  %v2427_v11 = vmul.f32 %v2393_v48, %v2393_v48  ;;  %v2441_v62 = vmul.f32 0.03125, %v1968_v3 }
 0x12d   :  { %v1038_v49 = vmul.f32 %v1174_v32, %v3444_v34  ;;  %v1037_v44 = vmul.f32 %v1176_v39, %v3445_v28  ;;  %1185 = vrsqrt.f32 %v852_v1  ;;  %v790_v51 = vmax.f32 %v726_v42, 0.0  ;;  %v373_v27 = vpop.xlane.xlu0 %372 }
 0x12e   :  { %v600_v56 = vmul.f32 0.03125, %v376_v41  ;;  %1187 = vrsqrt.f32 %v851_v4  ;;  %v789_v8 = vmax.f32 %v725_v54, 0.0  ;;  %v599_v25 = vmul.f32 0.03125, %v373_v27  ;;  %v2462_v41 = vld [vmem:[%s3276_s0 + $0xe0] sm:$0xff]  ;;  %v2485_v27 = vld [vmem:[%s3276_s0 + $0xf8] sm:$0xff] }
 0x12f   :  { %1102 = vst.msk [vmem:[%s3277_s1 + $0x28] sm:$0xff] %vm72_vm0, %v1038_v49  ;;  %v1178_v15 = vpop.eup %1177  ;;  %1101 = vst.msk [vmem:[%s3277_s1 + $0x20] sm:$0xff] %vm72_vm0, %v1037_v44  ;;  %v854_v26 = vadd.f32 1e-05, %v790_v51  ;;  %v2450_v7 = vmul.f32 %v2416_v47, %v2416_v47  ;;  %v3446_v32 = vsub.f32 %v1387_v12, %v2127_v14  ;;  %v3447_v34 = vsub.f32 %v3412_v20, %v2142_v13 }
 0x130   :  { %v728_v46 = vsub.f32 %v600_v56, %v2243_v36  ;;  %v1180_v2 = vpop.eup %1179  ;;  %v853_v42 = vadd.f32 1e-05, %v789_v8  ;;  %v727_v3 = vsub.f32 %v599_v25, %v2252_v18  ;;  %v382_v39 = vpop.xlane.xlu1 %381  ;;  %v2472_v18 = vmul.f32 %v2441_v62, %v2441_v62  ;;  %v2566_v8 = vld [vmem:[%s3276_s0 + $0x100] sm:$0xff] }
 0x131   :  { %v1040_v1 = vmul.f32 %v1178_v15, %v3446_v32  ;;  %v1039_v49 = vmul.f32 %v1180_v2, %v3447_v34  ;;  %1189 = vrsqrt.f32 %v854_v26  ;;  %v602_v36 = vmul.f32 0.03125, %v382_v39  ;;  %v379_v54 = vpop.xlane.xlu0 %378  ;;  %v3450_v32 = vld [vmem:[#allocation4_spill] sm:$0xff] }
 0x132   :  { %v792_v4 = vmax.f32 %v728_v46, 0.0  ;;  %1191 = vrsqrt.f32 %v853_v42  ;;  %v791_v14 = vmax.f32 %v727_v3, 0.0  ;;  %v601_v13 = vmul.f32 0.03125, %v379_v54 }
 0x133   :  { %1104 = vst.msk [vmem:[%s3277_s1 + $0x38] sm:$0xff] %vm72_vm0, %v1040_v1  ;;  %v1182_v20 = vpop.eup %1181  ;;  %v2475_v28 = vmul.f32 0.03125, %v1970_v19  ;;  %1103 = vst.msk [vmem:[%s3277_s1 + $0x30] sm:$0xff] %vm72_vm0, %v1039_v49  ;;  %v730_v51 = vsub.f32 %v602_v36, %v2258_v6  ;;  %v3448_v19 = vld [vmem:[#allocation2_spill] sm:$0xff]  ;;  %v3453_v49 = vld [vmem:[#allocation29_spill] sm:$0xff]  ;;  %v2601_v22 = vmul.f32 0.03125, %v3475_v60 }
 0x134   :  { %v856_v44 = vadd.f32 1e-05, %v792_v4  ;;  %v1184_v56 = vpop.eup %1183  ;;  %v3449_v25 = vsub.f32 %v1401_v16, %v3448_v19  ;;  %v855_v26 = vadd.f32 1e-05, %v791_v14  ;;  %v729_v46 = vsub.f32 %v601_v13, %v2270_v63  ;;  %v388_v2 = vpop.xlane.xlu1 %387  ;;  %v3451_v1 = vld [vmem:[#allocation50_spill] sm:$0xff]  ;;  %v2510_v14 = vld [vmem:[%s3276_s0 + $0xf0] sm:$0xff] }
 0x135   :  { %v3452_v6 = vsub.f32 %v3450_v32, %v3451_v1  ;;  %v794_v3 = vmax.f32 %v730_v51, 0.0  ;;  %v604_v39 = vmul.f32 0.03125, %v388_v2  ;;  %v385_v34 = vpop.xlane.xlu0 %384  ;;  %v2497_v4 = vmul.f32 0.03125, %v3453_v49 }
 0x136   :  { %v1042_v15 = vmul.f32 %v1182_v20, %v3449_v25  ;;  %1193 = vrsqrt.f32 %v856_v44  ;;  %v793_v16 = vmax.f32 %v729_v46, 0.0  ;;  %v603_v63 = vmul.f32 0.03125, %v385_v34  ;;  %v3455_v25 = vld [vmem:[#allocation5_spill] sm:$0xff]  ;;  %v3459_v34 = vld [vmem:[#allocation52_spill] sm:$0xff] }
 0x137   :  { %v1041_v42 = vmul.f32 %v1184_v56, %v3452_v6  ;;  %1195 = vrsqrt.f32 %v855_v26  ;;  %v1186_v36 = vpop.eup %1185  ;;  %v2505_v54 = vmul.f32 %v2475_v28, %v2475_v28  ;;  %v858_v20 = vadd.f32 1e-05, %v794_v3  ;;  %v3454_v56 = vld [vmem:[#allocation30_spill] sm:$0xff] }
 0x138   :  { %1106 = vst.msk [vmem:[%s3277_s1 + $0x48] sm:$0xff] %vm72_vm0, %v1042_v15  ;;  %v732_v44 = vsub.f32 %v604_v39, %v2281_v24  ;;  %v1188_v51 = vpop.eup %1187  ;;  %v2520_v19 = vmul.f32 0.03125, %v3454_v56  ;;  %v3456_v15 = vld [vmem:[#allocation51_spill] sm:$0xff]  ;;  %v857_v2 = vadd.f32 1e-05, %v793_v16  ;;  %v731_v32 = vsub.f32 %v603_v63, %v2287_v35  ;;  %v394_v1 = vpop.xlane.xlu1 %393  ;;  %v3458_v6 = vld [vmem:[#allocation6_spill] sm:$0xff] }
 0x139   :  { %1105 = vst.msk [vmem:[%s3277_s1 + $0x40] sm:$0xff] %vm72_vm0, %v1041_v42  ;;  %v3457_v26 = vsub.f32 %v3455_v25, %v3456_v15  ;;  %v3460_v49 = vsub.f32 %v3458_v6, %v3459_v34  ;;  %1197 = vrsqrt.f32 %v858_v20  ;;  %v606_v3 = vmul.f32 0.03125, %v394_v1  ;;  %v391_v24 = vpop.xlane.xlu0 %390 }
 0x13a   :  { %v796_v42 = vmax.f32 %v732_v44, 0.0  ;;  %v2531_v39 = vmul.f32 %v2497_v4, %v2497_v4  ;;  %1199 = vrsqrt.f32 %v857_v2  ;;  %v795_v35 = vmax.f32 %v731_v32, 0.0  ;;  %v3461_v44 = vld [vmem:[#allocation31_spill] sm:$0xff] }
 0x13b   :  { %v1044_v46 = vmul.f32 %v1186_v36, %v3457_v26  ;;  %v1043_v13 = vmul.f32 %v1188_v51, %v3460_v49  ;;  %v605_v16 = vmul.f32 0.03125, %v391_v24  ;;  %v1190_v63 = vpop.eup %1189  ;;  %v2540_v36 = vld [vmem:[%s3276_s0 + $0x108] sm:$0xff]  ;;  %v2545_v51 = vmul.f32 0.03125, %v3461_v44  ;;  %v3465_v24 = vld [vmem:[#allocation8_spill] sm:$0xff] }
 0x13c   :  { %v860_v56 = vadd.f32 1e-05, %v796_v42  ;;  %v734_v25 = vsub.f32 %v606_v3, %v2296_v43  ;;  %v1192_v15 = vpop.eup %1191  ;;  %v2554_v26 = vmul.f32 %v2520_v19, %v2520_v19  ;;  %v3463_v2 = vld [vmem:[#allocation3_spill] sm:$0xff]  ;;  %v859_v6 = vadd.f32 1e-05, %v795_v35  ;;  %v400_v49 = vpop.xlane.xlu1 %399 }
 0x13d   :  { %1108 = vst.msk [vmem:[%s3277_s1 + $0x58] sm:$0xff] %vm72_vm0, %v1044_v46  ;;  %1107 = vst.msk [vmem:[%s3277_s1 + $0x50] sm:$0xff] %vm72_vm0, %v1043_v13  ;;  %v3462_v46 = vld [vmem:[#allocation7_spill] sm:$0xff]  ;;  %v733_v34 = vsub.f32 %v605_v16, %v2306_v10  ;;  %v608_v43 = vmul.f32 0.03125, %v400_v49  ;;  %v397_v3 = vpop.xlane.xlu0 %396 }
 0x13e   :  { %v3464_v32 = vsub.f32 %v3462_v46, %v3463_v2  ;;  %v3466_v44 = vld [vmem:[#allocation55_spill] sm:$0xff]  ;;  %1201 = vrsqrt.f32 %v860_v56  ;;  %v798_v42 = vmax.f32 %v734_v25, 0.0  ;;  %v607_v35 = vmul.f32 0.03125, %v397_v3  ;;  %v3468_v56 = vld [vmem:[#allocation32_spill] sm:$0xff] }
 0x13f   :  { %v3467_v20 = vsub.f32 %v3465_v24, %v3466_v44  ;;  %1203 = vrsqrt.f32 %v859_v6  ;;  %v797_v10 = vmax.f32 %v733_v34, 0.0  ;;  %v2579_v25 = vmul.f32 0.03125, %v3468_v56  ;;  %v3469_v6 = vld [vmem:[#allocation9_spill] sm:$0xff]  ;;  %v3470_v34 = vld [vmem:[#allocation56_spill] sm:$0xff] }
 0x140   :  { %v1046_v1 = vmul.f32 %v1190_v63, %v3464_v32  ;;  %v1194_v16 = vpop.eup %1193  ;;  %v736_v46 = vsub.f32 %v608_v43, %v2319_v57  ;;  %v2589_v32 = vld [vmem:[%s3276_s0 + $0x118] sm:$0xff]  ;;  %v3471_v49 = vsub.f32 %v3469_v6, %v3470_v34  ;;  %v735_v3 = vsub.f32 %v607_v35, %v2327_v53  ;;  %v3476_v6 = vld [vmem:[#allocation34_spill] sm:$0xff] }
 0x141   :  { %v1045_v13 = vmul.f32 %v1192_v15, %v3467_v20  ;;  %v2576_v20 = vmul.f32 %v2545_v51, %v2545_v51  ;;  %v862_v15 = vadd.f32 1e-05, %v798_v42  ;;  %v1196_v2 = vpop.eup %1195  ;;  %v861_v44 = vadd.f32 1e-05, %v797_v10  ;;  %v3472_v42 = vld [vmem:[#allocation10_spill] sm:$0xff]  ;;  %v3473_v56 = vld [vmem:[#allocation57_spill] sm:$0xff]  ;;  %v403_v29 = vpop.xlane.xlu0 %402 }
 0x142   :  { %1110 = vst.msk [vmem:[%s3277_s1 + $0x68] sm:$0xff] %vm72_vm0, %v1046_v1  ;;  %v1048_v24 = vmul.f32 %v1194_v16, %v3471_v49  ;;  %v3474_v57 = vsub.f32 %v3472_v42, %v3473_v56  ;;  %v800_v63 = vmax.f32 %v736_v46, 0.0  ;;  %v799_v10 = vmax.f32 %v735_v3, 0.0  ;;  %v3478_v49 = vld [vmem:[#allocation58_spill] sm:$0xff]  ;;  %v3480_v56 = vld [vmem:[#allocation12_spill] sm:$0xff] }
 0x143   :  { %1109 = vst.msk [vmem:[%s3277_s1 + $0x60] sm:$0xff] %vm72_vm0, %v1045_v13  ;;  %v406_v13 = vpop.xlane.xlu1 %405  ;;  %1205 = vrsqrt.f32 %v862_v15  ;;  %v609_v53 = vmul.f32 0.03125, %v403_v29  ;;  %v1198_v35 = vpop.eup %1197  ;;  %v2609_v16 = vmul.f32 %v2579_v25, %v2579_v25  ;;  %v2614_v15 = vld [vmem:[%s3276_s0 + $0x110] sm:$0xff]  ;;  %v2624_v34 = vmul.f32 0.03125, %v3476_v6 }
 0x144   :  { %v1047_v43 = vmul.f32 %v1196_v2, %v3474_v57  ;;  %v610_v12 = vmul.f32 0.03125, %v406_v13  ;;  %1112 = vst.msk [vmem:[%s3277_s1 + $0x78] sm:$0xff] %vm72_vm0, %v1048_v24  ;;  %1207 = vrsqrt.f32 %v861_v44  ;;  %v864_v46 = vadd.f32 1e-05, %v800_v63  ;;  %v1200_v2 = vpop.eup %1199  ;;  %v3481_v57 = vld [vmem:[#allocation59_spill] sm:$0xff] }
 0x145   :  { %3477 = vst [vmem:[#allocation16_spill] sm:$0xff] %v2624_v34  ;;  %v3479_v24 = vsub.f32 %v3427_v5, %v3478_v49  ;;  %v863_v3 = vadd.f32 1e-05, %v799_v10  ;;  %v737_v13 = vsub.f32 %v609_v53, %v2346_v37  ;;  %v3482_v60 = vsub.f32 %v3480_v56, %v3481_v57  ;;  %v2644_v53 = vld [vmem:[%s3276_s0 + $0x128] sm:$0xff] }
 0x146   :  { %1111 = vst.msk [vmem:[%s3277_s1 + $0x70] sm:$0xff] %vm72_vm0, %v1047_v43  ;;  %v738_v29 = vsub.f32 %v610_v12, %v2336_v50  ;;  %1209 = vrsqrt.f32 %v864_v46  ;;  %v409_v50 = vpop.xlane.xlu0 %408  ;;  %v2635_v12 = vmul.f32 %v2601_v22, %v2601_v22  ;;  %v2658_v49 = vmul.f32 %v2624_v34, %v2624_v34 }
 0x147   :  { %v1050_v44 = vmul.f32 %v1198_v35, %v3479_v24  ;;  %v412_v42 = vpop.xlane.xlu1 %411  ;;  %v1049_v1 = vmul.f32 %v1200_v2, %v3482_v60  ;;  %1211 = vrsqrt.f32 %v863_v3  ;;  %v801_v5 = vmax.f32 %v737_v13, 0.0  ;;  %v3483_v60 = vld [vmem:[#allocation35_spill] sm:$0xff]  ;;  %v3484_v24 = vld [vmem:[#allocation13_spill] sm:$0xff] }
 0x148   :  { %v802_v63 = vmax.f32 %v738_v29, 0.0  ;;  %v612_v43 = vmul.f32 0.03125, %v412_v42  ;;  %v611_v37 = vmul.f32 0.03125, %v409_v50  ;;  %v1202_v10 = vpop.eup %1201  ;;  %v2649_v46 = vmul.f32 0.03125, %v3483_v60  ;;  %v2670_v60 = vld [vmem:[%s3276_s0 + $0x120] sm:$0xff] }
 0x149   :  { %1114 = vst.msk [vmem:[%s3277_s1 + $0x88] sm:$0xff] %vm72_vm0, %v1050_v44  ;;  %1113 = vst.msk [vmem:[%s3277_s1 + $0x80] sm:$0xff] %vm72_vm0, %v1049_v1  ;;  %v1204_v6 = vpop.eup %1203  ;;  %v3485_v44 = vld [vmem:[#allocation60_spill] sm:$0xff]  ;;  %v865_v42 = vadd.f32 1e-05, %v801_v5  ;;  %v3487_v50 = vsub.f32 %v3432_v23, %v2264_v21  ;;  %v2705_v34 = vmul.f32 0.03125, %v3494_v33 }
 0x14a   :  { %v866_v29 = vadd.f32 1e-05, %v802_v63  ;;  %v740_v2 = vsub.f32 %v612_v43, %v2368_v30  ;;  %v3486_v3 = vsub.f32 %v3484_v24, %v3485_v44  ;;  %v739_v56 = vsub.f32 %v611_v37, %v2401_v0  ;;  %v415_v43 = vpop.xlane.xlu0 %414  ;;  %v3488_v37 = vld [vmem:[#allocation36_spill] sm:$0xff]  ;;  %v2693_v44 = vld [vmem:[%s3276_s0 + $0x138] sm:$0xff] }
 0x14b   :  { %v418_v57 = vpop.xlane.xlu1 %417  ;;  %v1051_v1 = vmul.f32 %v1204_v6, %v3487_v50  ;;  %v613_v23 = vmul.f32 0.03125, %v415_v43  ;;  %v2680_v5 = vmul.f32 %v2649_v46, %v2649_v46 }
 0x14c   :  { %v1052_v13 = vmul.f32 %v1202_v10, %v3486_v3  ;;  %1213 = vrsqrt.f32 %v866_v29  ;;  %v804_v63 = vmax.f32 %v740_v2, 0.0  ;;  %v614_v30 = vmul.f32 0.03125, %v418_v57 }
 0x14d   :  { %1215 = vrsqrt.f32 %v865_v42  ;;  %v803_v21 = vmax.f32 %v739_v56, 0.0  ;;  %v1206_v0 = vpop.eup %1205  ;;  %v2683_v29 = vmul.f32 0.03125, %v3488_v37  ;;  %1115 = vst.msk [vmem:[%s3277_s1 + $0x90] sm:$0xff] %vm72_vm0, %v1051_v1  ;;  %v3490_v42 = vld [vmem:[#allocation11_spill] sm:$0xff]  ;;  %v741_v43 = vsub.f32 %v613_v23, %v2450_v7 }
 0x14e   :  { %1116 = vst.msk [vmem:[%s3277_s1 + $0x98] sm:$0xff] %vm72_vm0, %v1052_v13  ;;  %v868_v2 = vadd.f32 1e-05, %v804_v63  ;;  %v742_v6 = vsub.f32 %v614_v30, %v2427_v11  ;;  %v1208_v24 = vpop.eup %1207  ;;  %v3489_v13 = vld [vmem:[#allocation15_spill] sm:$0xff]  ;;  %v3492_v63 = vld [vmem:[#allocation61_spill] sm:$0xff]  ;;  %v421_v35 = vpop.xlane.xlu0 %420 }
 0x14f   :  { %v3491_v56 = vsub.f32 %v3489_v13, %v3490_v42  ;;  %v867_v50 = vadd.f32 1e-05, %v803_v21  ;;  %v424_v1 = vpop.xlane.xlu1 %423  ;;  %v3493_v11 = vsub.f32 %v3436_v58, %v3492_v63  ;;  %v805_v21 = vmax.f32 %v741_v43, 0.0  ;;  %v3496_v42 = vld [vmem:[#allocation14_spill] sm:$0xff] }
 0x150   :  { %1217 = vrsqrt.f32 %v868_v2  ;;  %v806_v37 = vmax.f32 %v742_v6, 0.0  ;;  %v616_v10 = vmul.f32 0.03125, %v424_v1  ;;  %v615_v7 = vmul.f32 0.03125, %v421_v35  ;;  %v1210_v23 = vpop.eup %1209  ;;  %v3498_v63 = vld [vmem:[#allocation18_spill] sm:$0xff] }
 0x151   :  { %v1054_v57 = vmul.f32 %v1206_v0, %v3491_v56  ;;  %v1053_v30 = vmul.f32 %v1208_v24, %v3493_v11  ;;  %1219 = vrsqrt.f32 %v867_v50  ;;  %v2713_v58 = vmul.f32 %v2683_v29, %v2683_v29  ;;  %v2718_v0 = vld [vmem:[%s3276_s0 + $0x130] sm:$0xff]  ;;  %v1212_v6 = vpop.eup %1211  ;;  %v3495_v24 = vld [vmem:[#allocation38_spill] sm:$0xff] }
 0x152   :  { %v870_v2 = vadd.f32 1e-05, %v806_v37  ;;  %v744_v35 = vsub.f32 %v616_v10, %v2472_v18  ;;  %v2728_v13 = vmul.f32 0.03125, %v3495_v24  ;;  %v3497_v56 = vsub.f32 %v3437_v17, %v3496_v42  ;;  %v3499_v11 = vld [vmem:[#allocation62_spill] sm:$0xff]  ;;  %v427_v18 = vpop.xlane.xlu0 %426 }
 0x153   :  { %1118 = vst.msk [vmem:[%s3277_s1 + $0xa8] sm:$0xff] %vm72_vm0, %v1054_v57  ;;  %1117 = vst.msk [vmem:[%s3277_s1 + $0xa0] sm:$0xff] %vm72_vm0, %v1053_v30  ;;  %v869_v50 = vadd.f32 1e-05, %v805_v21  ;;  %v743_v43 = vsub.f32 %v615_v7, %v2505_v54  ;;  %v430_v1 = vpop.xlane.xlu1 %429  ;;  %v3500_v33 = vsub.f32 %v3498_v63, %v3499_v11  ;;  %v2739_v10 = vmul.f32 %v2705_v34, %v2705_v34  ;;  %v2748_v7 = vld [vmem:[%s3276_s0 + $0x148] sm:$0xff] }
 0x154   :  { %v1056_v57 = vmul.f32 %v1210_v23, %v3497_v56  ;;  %1221 = vrsqrt.f32 %v870_v2  ;;  %v808_v30 = vmax.f32 %v744_v35, 0.0  ;;  %v618_v37 = vmul.f32 0.03125, %v430_v1 }
 0x155   :  { %v1055_v3 = vmul.f32 %v1212_v6, %v3500_v33  ;;  %1223 = vrsqrt.f32 %v869_v50  ;;  %v807_v17 = vmax.f32 %v743_v43, 0.0  ;;  %v617_v54 = vmul.f32 0.03125, %v427_v18  ;;  %v3501_v33 = vld [vmem:[#allocation39_spill] sm:$0xff]  ;;  %v3504_v18 = vld [vmem:[#allocation40_spill] sm:$0xff] }
 0x156   :  { %1120 = vst.msk [vmem:[%s3277_s1 + $0xb8] sm:$0xff] %vm72_vm0, %v1056_v57  ;;  %v1214_v21 = vpop.eup %1213  ;;  %v1010_v23 = vsub.f32 %v2748_v7, %v2705_v34  ;;  %v2753_v2 = vmul.f32 0.03125, %v3501_v33  ;;  %v872_v35 = vadd.f32 1e-05, %v808_v30  ;;  %v746_v6 = vsub.f32 %v618_v37, %v2531_v39  ;;  %v433_v30 = vpop.xlane.xlu0 %432  ;;  %v2774_v37 = vld [vmem:[%s3276_s0 + $0x140] sm:$0xff] }
 0x157   :  { %1119 = vst.msk [vmem:[%s3277_s1 + $0xb0] sm:$0xff] %vm72_vm0, %v1055_v3  ;;  %v1216_v24 = vpop.eup %1215  ;;  %v2762_v42 = vmul.f32 %v2728_v13, %v2728_v13  ;;  %v3502_v56 = vsub.f32 %v3439_v55, %v2315_v38  ;;  %v871_v50 = vadd.f32 1e-05, %v807_v17  ;;  %v745_v43 = vsub.f32 %v617_v54, %v2554_v26  ;;  %v436_v1 = vpop.xlane.xlu1 %435 }
 0x158   :  { %v3503_v63 = vsub.f32 %v2358_v59, %v2330_v52  ;;  %1225 = vrsqrt.f32 %v872_v35  ;;  %v810_v11 = vmax.f32 %v746_v6, 0.0  ;;  %v620_v39 = vmul.f32 0.03125, %v436_v1  ;;  %v2797_v35 = vld [vmem:[%s3276_s0 + $0x158] sm:$0xff] }
 0x159   :  { %v1058_v57 = vmul.f32 %v1214_v21, %v3502_v56  ;;  %v1009_v38 = vsub.f32 %v2774_v37, %v2728_v13  ;;  %1227 = vrsqrt.f32 %v871_v50  ;;  %v809_v52 = vmax.f32 %v745_v43, 0.0  ;;  %v3051_v13 = vld [vmem:[%s3276_s0 + $0x1a8] sm:$0xff] }
 0x15a   :  { %v1057_v3 = vmul.f32 %v1216_v24, %v3503_v63  ;;  %v619_v55 = vmul.f32 0.03125, %v433_v30  ;;  %v1218_v59 = vpop.eup %1217  ;;  %v2784_v26 = vmul.f32 %v2753_v2, %v2753_v2  ;;  %v2787_v17 = vmul.f32 0.03125, %v3504_v18 }
 0x15b   :  { %1122 = vst.msk [vmem:[%s3277_s1 + $0xc8] sm:$0xff] %vm72_vm0, %v1058_v57  ;;  %v874_v54 = vadd.f32 1e-05, %v810_v11  ;;  %v748_v21 = vsub.f32 %v620_v39, %v2576_v20  ;;  %v1220_v33 = vpop.eup %1219  ;;  %v1012_v6 = vsub.f32 %v2797_v35, %v2753_v2  ;;  %v3505_v24 = vsub.f32 %v2381_v31, %v2339_v61  ;;  %v442_v43 = vpop.xlane.xlu1 %441  ;;  %v3507_v39 = vld [vmem:[#allocation41_spill] sm:$0xff] }
 0x15c   :  { %1121 = vst.msk [vmem:[%s3277_s1 + $0xc0] sm:$0xff] %vm72_vm0, %v1057_v3  ;;  %v873_v57 = vadd.f32 1e-05, %v809_v52  ;;  %v747_v50 = vsub.f32 %v619_v55, %v2609_v16  ;;  %v3506_v20 = vsub.f32 %v2406_v45, %v2371_v40  ;;  %v622_v3 = vmul.f32 0.03125, %v442_v43  ;;  %v439_v11 = vpop.xlane.xlu0 %438  ;;  %v2822_v45 = vld [vmem:[%s3276_s0 + $0x150] sm:$0xff] }
 0x15d   :  { %v1060_v56 = vmul.f32 %v1218_v59, %v3505_v24  ;;  %1229 = vrsqrt.f32 %v874_v54  ;;  %v812_v63 = vmax.f32 %v748_v21, 0.0  ;;  %v2809_v30 = vmul.f32 0.03125, %v3507_v39  ;;  %v3508_v54 = vld [vmem:[#allocation42_spill] sm:$0xff] }
 0x15e   :  { %v1059_v1 = vmul.f32 %v1220_v33, %v3506_v20  ;;  %1231 = vrsqrt.f32 %v873_v57  ;;  %v811_v61 = vmax.f32 %v747_v50, 0.0  ;;  %v621_v31 = vmul.f32 0.03125, %v439_v11  ;;  %v1222_v16 = vpop.eup %1221  ;;  %v3511_v11 = vld [vmem:[#allocation20_spill] sm:$0xff] }
 0x15f   :  { %1124 = vst.msk [vmem:[%s3277_s1 + $0xd8] sm:$0xff] %vm72_vm0, %v1060_v56  ;;  %v2817_v40 = vmul.f32 %v2787_v17, %v2787_v17  ;;  %v1011_v52 = vsub.f32 %v2822_v45, %v2787_v17  ;;  %v876_v55 = vadd.f32 1e-05, %v812_v63  ;;  %v750_v59 = vsub.f32 %v622_v3, %v2635_v12  ;;  %v1224_v18 = vpop.eup %1223  ;;  %v448_v50 = vpop.xlane.xlu1 %447  ;;  %v3533_v17 = vld [vmem:[#allocation45_spill] sm:$0xff] }
 0x160   :  { %1123 = vst.msk [vmem:[%s3277_s1 + $0xd0] sm:$0xff] %vm72_vm0, %v1059_v1  ;;  %v2832_v21 = vmul.f32 0.03125, %v3508_v54  ;;  %v3509_v33 = vsub.f32 %v2436_v9, %v2393_v48  ;;  %v875_v56 = vadd.f32 1e-05, %v811_v61  ;;  %v749_v57 = vsub.f32 %v621_v31, %v2658_v49  ;;  %v445_v12 = vpop.xlane.xlu0 %444 }
 0x161   :  { %v3510_v43 = vsub.f32 %v2462_v41, %v2416_v47  ;;  %1233 = vrsqrt.f32 %v876_v55  ;;  %v814_v1 = vmax.f32 %v750_v59, 0.0  ;;  %v624_v63 = vmul.f32 0.03125, %v448_v50  ;;  %v2852_v47 = vld [vmem:[%s3276_s0 + $0x168] sm:$0xff] }
 0x162   :  { %v1062_v24 = vmul.f32 %v1222_v16, %v3509_v33  ;;  %v2843_v3 = vmul.f32 %v2809_v30, %v2809_v30  ;;  %1235 = vrsqrt.f32 %v875_v56  ;;  %v813_v48 = vmax.f32 %v749_v57, 0.0  ;;  %v1226_v49 = vpop.eup %1225 }
 0x163   :  { %v1061_v20 = vmul.f32 %v1224_v18, %v3510_v43  ;;  %v623_v9 = vmul.f32 0.03125, %v445_v12  ;;  %v1014_v41 = vsub.f32 %v2852_v47, %v2809_v30  ;;  %v2857_v39 = vmul.f32 0.03125, %v3511_v11  ;;  %v1228_v16 = vpop.eup %1227 }
 0x164   :  { %1126 = vst.msk [vmem:[%s3277_s1 + $0xe8] sm:$0xff] %vm72_vm0, %v1062_v24  ;;  %v878_v61 = vadd.f32 1e-05, %v814_v1  ;;  %v752_v31 = vsub.f32 %v624_v63, %v2680_v5  ;;  %v2866_v55 = vmul.f32 %v2832_v21, %v2832_v21  ;;  %v3512_v59 = vsub.f32 %v2485_v27, %v2441_v62  ;;  %v454_v24 = vpop.xlane.xlu1 %453  ;;  %v451_v43 = vpop.xlane.xlu0 %450  ;;  %v3514_v1 = vld [vmem:[#allocation21_spill] sm:$0xff] }
 0x165   :  { %1125 = vst.msk [vmem:[%s3277_s1 + $0xe0] sm:$0xff] %vm72_vm0, %v1061_v20  ;;  %v877_v54 = vadd.f32 1e-05, %v813_v48  ;;  %v751_v33 = vsub.f32 %v623_v9, %v2713_v58  ;;  %v3513_v56 = vsub.f32 %v2510_v14, %v2475_v28  ;;  %v626_v5 = vmul.f32 0.03125, %v454_v24  ;;  %v2878_v20 = vld [vmem:[%s3276_s0 + $0x160] sm:$0xff] }
 0x166   :  { %v1064_v18 = vmul.f32 %v1226_v49, %v3512_v59  ;;  %1237 = vrsqrt.f32 %v878_v61  ;;  %v816_v50 = vmax.f32 %v752_v31, 0.0  ;;  %v1013_v62 = vsub.f32 %v2878_v20, %v2832_v21  ;;  %v2901_v49 = vld [vmem:[%s3276_s0 + $0x178] sm:$0xff] }
 0x167   :  { %v1063_v57 = vmul.f32 %v1228_v16, %v3513_v56  ;;  %1239 = vrsqrt.f32 %v877_v54  ;;  %v815_v28 = vmax.f32 %v751_v33, 0.0  ;;  %v625_v27 = vmul.f32 0.03125, %v451_v43  ;;  %v1230_v14 = vpop.eup %1229 }
 0x168   :  { %1128 = vst.msk [vmem:[%s3277_s1 + $0xf8] sm:$0xff] %vm72_vm0, %v1064_v18  ;;  %v2888_v58 = vmul.f32 %v2857_v39, %v2857_v39  ;;  %v2891_v63 = vmul.f32 0.03125, %v3514_v1  ;;  %v880_v12 = vadd.f32 1e-05, %v816_v50  ;;  %v754_v48 = vsub.f32 %v626_v5, %v2739_v10  ;;  %v1232_v9 = vpop.eup %1231  ;;  %v460_v18 = vpop.xlane.xlu1 %459 }
 0x169   :  { %1127 = vst.msk [vmem:[%s3277_s1 + $0xf0] sm:$0xff] %vm72_vm0, %v1063_v57  ;;  %v1016_v11 = vsub.f32 %v2901_v49, %v2857_v39  ;;  %v3515_v61 = vsub.f32 %v2540_v36, %v2497_v4  ;;  %v879_v16 = vadd.f32 1e-05, %v815_v28  ;;  %v753_v59 = vsub.f32 %v625_v27, %v2762_v42  ;;  %v457_v56 = vpop.xlane.xlu0 %456  ;;  %v3517_v57 = vld [vmem:[#allocation22_spill] sm:$0xff] }
 0x16a   :  { %v3516_v10 = vsub.f32 %v2566_v8, %v2520_v19  ;;  %1241 = vrsqrt.f32 %v880_v12  ;;  %v818_v33 = vmax.f32 %v754_v48, 0.0  ;;  %v628_v24 = vmul.f32 0.03125, %v460_v18  ;;  %v2926_v19 = vld [vmem:[%s3276_s0 + $0x170] sm:$0xff] }
 0x16b   :  { %v1066_v31 = vmul.f32 %v1230_v14, %v3515_v61  ;;  %v2913_v50 = vmul.f32 0.03125, %v3517_v57  ;;  %1243 = vrsqrt.f32 %v879_v16  ;;  %v817_v4 = vmax.f32 %v753_v59, 0.0  ;;  %v1234_v42 = vpop.eup %1233  ;;  %v3518_v14 = vld [vmem:[#allocation23_spill] sm:$0xff] }
 0x16c   :  { %v1065_v54 = vmul.f32 %v1232_v9, %v3516_v10  ;;  %v627_v36 = vmul.f32 0.03125, %v457_v56  ;;  %v2921_v8 = vmul.f32 %v2891_v63, %v2891_v63  ;;  %v1015_v5 = vsub.f32 %v2926_v19, %v2891_v63  ;;  %v1236_v27 = vpop.eup %1235  ;;  %v3537_v63 = vld [vmem:[#allocation49_spill] sm:$0xff] }
 0x16d   :  { %1130 = vst.msk [vmem:[%s3277_s1 + $0x108] sm:$0xff] %vm72_vm0, %v1066_v31  ;;  %v882_v43 = vadd.f32 1e-05, %v818_v33  ;;  %v756_v28 = vsub.f32 %v628_v24, %v2784_v26  ;;  %v2936_v1 = vmul.f32 0.03125, %v3518_v14  ;;  %v3519_v12 = vsub.f32 %v2589_v32, %v2545_v51  ;;  %v466_v31 = vpop.xlane.xlu1 %465  ;;  %v463_v26 = vpop.xlane.xlu0 %462  ;;  %v3521_v33 = vld [vmem:[#allocation24_spill] sm:$0xff] }
 0x16e   :  { %1129 = vst.msk [vmem:[%s3277_s1 + $0x100] sm:$0xff] %vm72_vm0, %v1065_v54  ;;  %v881_v9 = vadd.f32 1e-05, %v817_v4  ;;  %v755_v61 = vsub.f32 %v627_v36, %v2817_v40  ;;  %v3520_v16 = vsub.f32 %v2614_v15, %v2579_v25  ;;  %v630_v10 = vmul.f32 0.03125, %v466_v31  ;;  %v2956_v25 = vld [vmem:[%s3276_s0 + $0x188] sm:$0xff] }
 0x16f   :  { %v1068_v48 = vmul.f32 %v1234_v42, %v3519_v12  ;;  %1245 = vrsqrt.f32 %v882_v43  ;;  %v820_v18 = vmax.f32 %v756_v28, 0.0  ;;  %v2947_v54 = vmul.f32 %v2913_v50, %v2913_v50  ;;  %v3523_v12 = vld [vmem:[#allocation16_spill] sm:$0xff] }
 0x170   :  { %v1067_v59 = vmul.f32 %v1236_v27, %v3520_v16  ;;  %1247 = vrsqrt.f32 %v881_v9  ;;  %v819_v51 = vmax.f32 %v755_v61, 0.0  ;;  %v629_v32 = vmul.f32 0.03125, %v463_v26  ;;  %v1238_v40 = vpop.eup %1237  ;;  %v2980_v16 = vld [vmem:[%s3276_s0 + $0x180] sm:$0xff] }
 0x171   :  { %1132 = vst.msk [vmem:[%s3277_s1 + $0x118] sm:$0xff] %vm72_vm0, %v1068_v48  ;;  %v1018_v15 = vsub.f32 %v2956_v25, %v2913_v50  ;;  %v2961_v24 = vmul.f32 0.03125, %v3521_v33  ;;  %v884_v56 = vadd.f32 1e-05, %v820_v18  ;;  %v758_v57 = vsub.f32 %v630_v10, %v2843_v3  ;;  %v1240_v4 = vpop.eup %1239  ;;  %v472_v14 = vpop.xlane.xlu1 %471  ;;  %v3525_v18 = vld [vmem:[#allocation25_spill] sm:$0xff] }
 0x172   :  { %1131 = vst.msk [vmem:[%s3277_s1 + $0x110] sm:$0xff] %vm72_vm0, %v1067_v59  ;;  %v697_v36 = vmul.f32 %v2936_v1, %v2936_v1  ;;  %v3522_v42 = vsub.f32 %v2644_v53, %v2601_v22  ;;  %v883_v28 = vadd.f32 1e-05, %v819_v51  ;;  %v757_v27 = vsub.f32 %v629_v32, %v2866_v55  ;;  %v469_v3 = vpop.xlane.xlu0 %468 }
 0x173   :  { %v3524_v48 = vsub.f32 %v2670_v60, %v3523_v12  ;;  %1249 = vrsqrt.f32 %v884_v56  ;;  %v822_v61 = vmax.f32 %v758_v57, 0.0  ;;  %v632_v31 = vmul.f32 0.03125, %v472_v14 }
 0x174   :  { %v1070_v43 = vmul.f32 %v1238_v40, %v3522_v42  ;;  %v1017_v22 = vsub.f32 %v2980_v16, %v2936_v1  ;;  %1251 = vrsqrt.f32 %v883_v28  ;;  %v821_v53 = vmax.f32 %v757_v27, 0.0  ;;  %v1242_v55 = vpop.eup %1241  ;;  %v3001_v40 = vld [vmem:[%s3276_s0 + $0x198] sm:$0xff] }
 0x175   :  { %v1069_v9 = vmul.f32 %v1240_v4, %v3524_v48  ;;  %v631_v60 = vmul.f32 0.03125, %v469_v3  ;;  %v700_v59 = vmul.f32 %v2961_v24, %v2961_v24  ;;  %v2991_v10 = vmul.f32 0.03125, %v3525_v18  ;;  %v1244_v32 = vpop.eup %1243  ;;  %v3528_v48 = vld [vmem:[#allocation26_spill] sm:$0xff] }
 0x176   :  { %1134 = vst.msk [vmem:[%s3277_s1 + $0x128] sm:$0xff] %vm72_vm0, %v1070_v43  ;;  %v886_v26 = vadd.f32 1e-05, %v822_v61  ;;  %v760_v51 = vsub.f32 %v632_v31, %v2888_v58  ;;  %v1020_v33 = vsub.f32 %v3001_v40, %v2961_v24  ;;  %v3526_v56 = vsub.f32 %v2693_v44, %v2649_v46  ;;  %v478_v43 = vpop.xlane.xlu1 %477  ;;  %v475_v12 = vpop.xlane.xlu0 %474 }
 0x177   :  { %1133 = vst.msk [vmem:[%s3277_s1 + $0x120] sm:$0xff] %vm72_vm0, %v1069_v9  ;;  %v885_v4 = vadd.f32 1e-05, %v821_v53  ;;  %v759_v42 = vsub.f32 %v631_v60, %v2921_v8  ;;  %v3527_v58 = vsub.f32 %v2718_v0, %v2683_v29  ;;  %v634_v14 = vmul.f32 0.03125, %v478_v43  ;;  %v3529_v0 = vld [vmem:[#allocation27_spill] sm:$0xff]  ;;  %v3032_v60 = vld [vmem:[%s3276_s0 + $0x190] sm:$0xff] }
 0x178   :  { %v1072_v57 = vmul.f32 %v1242_v55, %v3526_v56  ;;  %1253 = vrsqrt.f32 %v886_v26  ;;  %v824_v27 = vmax.f32 %v760_v51, 0.0  ;;  %v3013_v9 = vmul.f32 0.03125, %v3528_v48 }
 0x179   :  { %v1071_v28 = vmul.f32 %v1244_v32, %v3527_v58  ;;  %1255 = vrsqrt.f32 %v885_v4  ;;  %v823_v46 = vmax.f32 %v759_v42, 0.0  ;;  %v633_v44 = vmul.f32 0.03125, %v475_v12  ;;  %v1246_v8 = vpop.eup %1245 }
 0x17a   :  { %1136 = vst.msk [vmem:[%s3277_s1 + $0x138] sm:$0xff] %vm72_vm0, %v1072_v57  ;;  %v699_v29 = vmul.f32 %v2991_v10, %v2991_v10  ;;  %v3022_v61 = vmul.f32 0.03125, %v3529_v0  ;;  %v888_v31 = vadd.f32 1e-05, %v824_v27  ;;  %v762_v3 = vsub.f32 %v634_v14, %v2947_v54  ;;  %v1248_v53 = vpop.eup %1247  ;;  %v484_v32 = vpop.xlane.xlu1 %483 }
 0x17b   :  { %1135 = vst.msk [vmem:[%s3277_s1 + $0x130] sm:$0xff] %vm72_vm0, %v1071_v28  ;;  %v1019_v55 = vsub.f32 %v3032_v60, %v2991_v10  ;;  %v1074_v18 = vmul.f32 %v1246_v8, %v1010_v23  ;;  %v887_v26 = vadd.f32 1e-05, %v823_v46  ;;  %v761_v51 = vsub.f32 %v633_v44, %v697_v36  ;;  %v481_v4 = vpop.xlane.xlu0 %480  ;;  %v3530_v28 = vld [vmem:[#allocation28_spill] sm:$0xff]  ;;  %v1321_v10 = vld [vmem:[%s3276_s0 + $0x1a0] sm:$0xff] }
 0x17c   :  { %v1073_v54 = vmul.f32 %v1248_v53, %v1009_v38  ;;  %1257 = vrsqrt.f32 %v888_v31  ;;  %v826_v56 = vmax.f32 %v762_v3, 0.0  ;;  %v636_v57 = vmul.f32 0.03125, %v484_v32 }
 0x17d   :  { %v702_v42 = vmul.f32 %v3013_v9, %v3013_v9  ;;  %1138 = vst.msk [vmem:[%s3277_s1 + $0x148] sm:$0xff] %vm72_vm0, %v1074_v18  ;;  %1259 = vrsqrt.f32 %v887_v26  ;;  %v825_v34 = vmax.f32 %v761_v51, 0.0  ;;  %v635_v7 = vmul.f32 0.03125, %v481_v4  ;;  %v1250_v23 = vpop.eup %1249 }
 0x17e   :  { %v1022_v37 = vsub.f32 %v3051_v13, %v3013_v9  ;;  %v701_v38 = vmul.f32 %v3022_v61, %v3022_v61  ;;  %1137 = vst.msk [vmem:[%s3277_s1 + $0x140] sm:$0xff] %vm72_vm0, %v1073_v54  ;;  %v890_v36 = vadd.f32 1e-05, %v826_v56  ;;  %v764_v43 = vsub.f32 %v636_v57, %v700_v59  ;;  %v1252_v58 = vpop.eup %1251  ;;  %v490_v46 = vpop.xlane.xlu1 %489  ;;  %v3531_v59 = vld [vmem:[#allocation43_spill] sm:$0xff] }
 0x17f   :  { %v3062_v27 = vmul.f32 0.03125, %v3530_v28  ;;  %v1076_v14 = vmul.f32 %v1250_v23, %v1012_v6  ;;  %v889_v12 = vadd.f32 1e-05, %v825_v34  ;;  %v763_v48 = vsub.f32 %v635_v7, %v699_v29  ;;  %v487_v31 = vpop.xlane.xlu0 %486  ;;  %v3532_v29 = vld [vmem:[#allocation44_spill] sm:$0xff] }
 0x180   :  { %v1075_v44 = vmul.f32 %v1252_v58, %v1011_v52  ;;  %1261 = vrsqrt.f32 %v890_v36  ;;  %v828_v8 = vmax.f32 %v764_v43, 0.0  ;;  %v638_v0 = vmul.f32 0.03125, %v490_v46  ;;  %v3534_v43 = vld [vmem:[#allocation46_spill] sm:$0xff] }
 0x181   :  { %v3071_v3 = vmul.f32 0.03125, %v3531_v59  ;;  %1140 = vst.msk [vmem:[%s3277_s1 + $0x158] sm:$0xff] %vm72_vm0, %v1076_v14  ;;  %1263 = vrsqrt.f32 %v889_v12  ;;  %v827_v2 = vmax.f32 %v763_v48, 0.0  ;;  %v637_v35 = vmul.f32 0.03125, %v487_v31  ;;  %v3535_v31 = vld [vmem:[#allocation47_spill] sm:$0xff] }
 0x182   :  { %v1254_v6 = vpop.eup %1253  ;;  %v3078_v53 = vmul.f32 0.03125, %v3532_v29  ;;  %v3081_v45 = vmul.f32 0.03125, %v3533_v17  ;;  %1139 = vst.msk [vmem:[%s3277_s1 + $0x150] sm:$0xff] %vm72_vm0, %v1075_v44  ;;  %v892_v52 = vadd.f32 1e-05, %v828_v8  ;;  %v766_v18 = vsub.f32 %v638_v0, %v702_v42  ;;  %v496_v57 = vpop.xlane.xlu1 %495 }
 0x183   :  { %v1256_v26 = vpop.eup %1255  ;;  %v704_v51 = vmul.f32 %v3062_v27, %v3062_v27  ;;  %v1078_v32 = vmul.f32 %v1254_v6, %v1014_v41  ;;  %v891_v54 = vadd.f32 1e-05, %v827_v2  ;;  %v765_v56 = vsub.f32 %v637_v35, %v701_v38  ;;  %v493_v23 = vpop.xlane.xlu0 %492  ;;  %v3536_v2 = vld [vmem:[#allocation48_spill] sm:$0xff] }
 0x184   :  { %v1077_v4 = vmul.f32 %v1256_v26, %v1013_v62  ;;  %1265 = vrsqrt.f32 %v892_v52  ;;  %v830_v34 = vmax.f32 %v766_v18, 0.0  ;;  %v640_v7 = vmul.f32 0.03125, %v496_v57 }
 0x185   :  { %v703_v42 = vmul.f32 %v3071_v3, %v3071_v3  ;;  %1142 = vst.msk [vmem:[%s3277_s1 + $0x168] sm:$0xff] %vm72_vm0, %v1078_v32  ;;  %1267 = vrsqrt.f32 %v891_v54  ;;  %v829_v30 = vmax.f32 %v765_v56, 0.0  ;;  %v639_v47 = vmul.f32 0.03125, %v493_v23  ;;  %v3538_v23 = vld [vmem:[#allocation53_spill] sm:$0xff] }
 0x186   :  { %v1258_v41 = vpop.eup %1257  ;;  %v706_v21 = vmul.f32 %v3078_v53, %v3078_v53  ;;  %v705_v20 = vmul.f32 %v3081_v45, %v3081_v45  ;;  %1141 = vst.msk [vmem:[%s3277_s1 + $0x160] sm:$0xff] %vm72_vm0, %v1077_v4  ;;  %v894_v62 = vadd.f32 1e-05, %v830_v34  ;;  %v768_v38 = vsub.f32 %v640_v7, %v704_v51  ;;  %v502_v48 = vpop.xlane.xlu1 %501 }
 0x187   :  { %v1260_v36 = vpop.eup %1259  ;;  %v3110_v58 = vmul.f32 0.03125, %v3534_v43  ;;  %v1080_v28 = vmul.f32 %v1258_v41, %v1016_v11  ;;  %v893_v14 = vadd.f32 1e-05, %v829_v30  ;;  %v767_v12 = vsub.f32 %v639_v47, %v703_v42  ;;  %v499_v0 = vpop.xlane.xlu0 %498  ;;  %v3539_v43 = vld [vmem:[#allocation54_spill] sm:$0xff] }
 0x188   :  { %v1079_v46 = vmul.f32 %v1260_v36, %v1015_v5  ;;  %1269 = vrsqrt.f32 %v894_v62  ;;  %v832_v44 = vmax.f32 %v768_v38, 0.0  ;;  %v642_v8 = vmul.f32 0.03125, %v502_v48 }
 0x189   :  { %v3119_v59 = vmul.f32 0.03125, %v3535_v31  ;;  %1144 = vst.msk [vmem:[%s3277_s1 + $0x178] sm:$0xff] %vm72_vm0, %v1080_v28  ;;  %1271 = vrsqrt.f32 %v893_v14  ;;  %v831_v39 = vmax.f32 %v767_v12, 0.0  ;;  %v641_v49 = vmul.f32 0.03125, %v499_v0 }
 0x18a   :  { %v1262_v11 = vpop.eup %1261  ;;  %v3126_v35 = vmul.f32 0.03125, %v3536_v2  ;;  %v3129_v19 = vmul.f32 0.03125, %v3537_v63  ;;  %1143 = vst.msk [vmem:[%s3277_s1 + $0x170] sm:$0xff] %vm72_vm0, %v1079_v46  ;;  %v896_v5 = vadd.f32 1e-05, %v832_v44  ;;  %v770_v6 = vsub.f32 %v642_v8, %v706_v21  ;;  %v508_v51 = vpop.xlane.xlu1 %507 }
 0x18b   :  { %v1264_v29 = vpop.eup %1263  ;;  %v708_v17 = vmul.f32 %v3110_v58, %v3110_v58  ;;  %v1082_v52 = vmul.f32 %v1262_v11, %v1018_v15  ;;  %v895_v18 = vadd.f32 1e-05, %v831_v39  ;;  %v769_v26 = vsub.f32 %v641_v49, %v705_v20  ;;  %v505_v57 = vpop.xlane.xlu0 %504 }
 0x18c   :  { %v1081_v32 = vmul.f32 %v1264_v29, %v1017_v22  ;;  %1273 = vrsqrt.f32 %v896_v5  ;;  %v834_v54 = vmax.f32 %v770_v6, 0.0  ;;  %v644_v56 = vmul.f32 0.03125, %v508_v51 }
 0x18d   :  { %v707_v4 = vmul.f32 %v3119_v59, %v3119_v59  ;;  %1146 = vst.msk [vmem:[%s3277_s1 + $0x188] sm:$0xff] %vm72_vm0, %v1082_v52  ;;  %1275 = vrsqrt.f32 %v895_v18  ;;  %v833_v50 = vmax.f32 %v769_v26, 0.0  ;;  %v643_v25 = vmul.f32 0.03125, %v505_v57 }
 0x18e   :  { %v1266_v15 = vpop.eup %1265  ;;  %v710_v1 = vmul.f32 %v3126_v35, %v3126_v35  ;;  %v709_v16 = vmul.f32 %v3129_v19, %v3129_v19  ;;  %1145 = vst.msk [vmem:[%s3277_s1 + $0x180] sm:$0xff] %vm72_vm0, %v1081_v32  ;;  %v898_v22 = vadd.f32 1e-05, %v834_v54  ;;  %v772_v34 = vsub.f32 %v644_v56, %v708_v17  ;;  %v514_v21 = vpop.xlane.xlu1 %513  ;;  %v1324_v54 = vld [vmem:[%s3276_s0 + $0x1c8] sm:$0xff] }
 0x18f   :  { %v1268_v7 = vpop.eup %1267  ;;  %v3158_v42 = vmul.f32 0.03125, %v3538_v23  ;;  %v1084_v30 = vmul.f32 %v1266_v15, %v1020_v33  ;;  %v897_v47 = vadd.f32 1e-05, %v833_v50  ;;  %v771_v41 = vsub.f32 %v643_v25, %v707_v4  ;;  %v511_v36 = vpop.xlane.xlu0 %510  ;;  %v1325_v4 = vld [vmem:[%s3276_s0 + $0x1c0] sm:$0xff] }
 0x190   :  { %v1083_v20 = vmul.f32 %v1268_v7, %v1019_v55  ;;  %1277 = vrsqrt.f32 %v898_v22  ;;  %v836_v62 = vmax.f32 %v772_v34, 0.0  ;;  %v646_v38 = vmul.f32 0.03125, %v514_v21  ;;  %v1322_v55 = vld [vmem:[%s3276_s0 + $0x1b8] sm:$0xff]  ;;  %v1327_v7 = vld [vmem:[%s3276_s0 + $0x1d0] sm:$0xff] }
 0x191   :  { %v3167_v28 = vmul.f32 0.03125, %v3539_v43  ;;  %1148 = vst.msk [vmem:[%s3277_s1 + $0x198] sm:$0xff] %vm72_vm0, %v1084_v30  ;;  %1279 = vrsqrt.f32 %v897_v47  ;;  %v835_v24 = vmax.f32 %v771_v41, 0.0  ;;  %v645_v40 = vmul.f32 0.03125, %v511_v36  ;;  %v1326_v22 = vld [vmem:[%s3276_s0 + $0x1d8] sm:$0xff]  ;;  %v1328_v41 = vld [vmem:[%s3276_s0 + $0x1e8] sm:$0xff] }
 0x192   :  { %v1270_v33 = vpop.eup %1269  ;;  %v1021_v60 = vsub.f32 %v1321_v10, %v3022_v61  ;;  %v1024_v14 = vsub.f32 %v1322_v55, %v3062_v27  ;;  %1147 = vst.msk [vmem:[%s3277_s1 + $0x190] sm:$0xff] %vm72_vm0, %v1083_v20  ;;  %v900_v12 = vadd.f32 1e-05, %v836_v62  ;;  %v774_v48 = vsub.f32 %v646_v38, %v710_v1  ;;  %v520_v31 = vpop.xlane.xlu1 %519  ;;  %v1329_v20 = vld [vmem:[%s3276_s0 + $0x1e0] sm:$0xff]  ;;  %v1330_v43 = vld [vmem:[%s3276_s0 + $0x1f8] sm:$0xff] }
 0x193   :  { %v1272_v46 = vpop.eup %1271  ;;  %v712_v44 = vmul.f32 %v3158_v42, %v3158_v42  ;;  %v1086_v61 = vmul.f32 %v1270_v33, %v1022_v37  ;;  %v899_v8 = vadd.f32 1e-05, %v835_v24  ;;  %v773_v0 = vsub.f32 %v645_v40, %v709_v16  ;;  %v517_v11 = vpop.xlane.xlu0 %516  ;;  %v1323_v37 = vld [vmem:[%s3276_s0 + $0x1b0] sm:$0xff] }
 0x194   :  { %v1085_v39 = vmul.f32 %v1272_v46, %v1021_v60  ;;  %1281 = vrsqrt.f32 %v900_v12  ;;  %v838_v27 = vmax.f32 %v774_v48, 0.0  ;;  %v648_v49 = vmul.f32 0.03125, %v520_v31  ;;  %v1331_v40 = vld [vmem:[%s3276_s0 + $0x1f0] sm:$0xff] }
 0x195   :  { %v711_v2 = vmul.f32 %v3167_v28, %v3167_v28  ;;  %1150 = vst.msk [vmem:[%s3277_s1 + $0x1a8] sm:$0xff] %vm72_vm0, %v1086_v61  ;;  %1283 = vrsqrt.f32 %v899_v8  ;;  %v837_v63 = vmax.f32 %v773_v0, 0.0  ;;  %v647_v9 = vmul.f32 0.03125, %v517_v11 }
 0x196   :  { %v1274_v13 = vpop.eup %1273  ;;  %v1023_v5 = vsub.f32 %v1323_v37, %v3071_v3  ;;  %1149 = vst.msk [vmem:[%s3277_s1 + $0x1a0] sm:$0xff] %vm72_vm0, %v1085_v39  ;;  %v902_v6 = vadd.f32 1e-05, %v838_v27  ;;  %v776_v29 = vsub.f32 %v648_v49, %v712_v44  ;;  %v1026_v3 = vsub.f32 %v1324_v54, %v3078_v53 }
 0x197   :  { %v1276_v17 = vpop.eup %1275  ;;  %v1088_v52 = vmul.f32 %v1274_v13, %v1024_v14  ;;  %v901_v18 = vadd.f32 1e-05, %v837_v63  ;;  %v775_v26 = vsub.f32 %v647_v9, %v711_v2  ;;  %v1025_v50 = vsub.f32 %v1325_v4, %v3081_v45 }
 0x198   :  { %v1087_v51 = vmul.f32 %v1276_v17, %v1023_v5  ;;  %1285 = vrsqrt.f32 %v902_v6  ;;  %v840_v32 = vmax.f32 %v776_v29, 0.0  ;;  %v1028_v34 = vsub.f32 %v1326_v22, %v3110_v58 }
 0x199   :  { %1152 = vst.msk [vmem:[%s3277_s1 + $0x1b8] sm:$0xff] %vm72_vm0, %v1088_v52  ;;  %1287 = vrsqrt.f32 %v901_v18  ;;  %v839_v56 = vmax.f32 %v775_v26, 0.0  ;;  %v1027_v23 = vsub.f32 %v1327_v7, %v3119_v59  ;;  %v1030_v21 = vsub.f32 %v1328_v41, %v3126_v35 }
 0x19a   :  { %v1278_v57 = vpop.eup %1277  ;;  %1151 = vst.msk [vmem:[%s3277_s1 + $0x1b0] sm:$0xff] %vm72_vm0, %v1087_v51  ;;  %v904_v53 = vadd.f32 1e-05, %v840_v32  ;;  %v1029_v62 = vsub.f32 %v1329_v20, %v3129_v19  ;;  %v1032_v24 = vsub.f32 %v1330_v43, %v3158_v42  ;;  %v1031_v33 = vsub.f32 %v1331_v40, %v3167_v28 }
 0x19b   :  { %v1280_v25 = vpop.eup %1279  ;;  %v1090_v15 = vmul.f32 %v1278_v57, %v1026_v3  ;;  %v903_v1 = vadd.f32 1e-05, %v839_v56 }
 0x19c   :  { %v1089_v16 = vmul.f32 %v1280_v25, %v1025_v50  ;;  %1289 = vrsqrt.f32 %v904_v53 }
 0x19d   :  { %1154 = vst.msk [vmem:[%s3277_s1 + $0x1c8] sm:$0xff] %vm72_vm0, %v1090_v15  ;;  %1291 = vrsqrt.f32 %v903_v1 }
 0x19e   :  { %v1282_v45 = vpop.eup %1281  ;;  %1153 = vst.msk [vmem:[%s3277_s1 + $0x1c0] sm:$0xff] %vm72_vm0, %v1089_v16 }
 0x19f   :  { %v1284_v30 = vpop.eup %1283  ;;  %v1092_v58 = vmul.f32 %v1282_v45, %v1028_v34 }
 0x1a0   :  { %v1091_v47 = vmul.f32 %v1284_v30, %v1027_v23 }
 0x1a1   :  { %1156 = vst.msk [vmem:[%s3277_s1 + $0x1d8] sm:$0xff] %vm72_vm0, %v1092_v58 }
 0x1a2   :  { %v1286_v59 = vpop.eup %1285  ;;  %1155 = vst.msk [vmem:[%s3277_s1 + $0x1d0] sm:$0xff] %vm72_vm0, %v1091_v47 }
 0x1a3   :  { %v1288_v38 = vpop.eup %1287  ;;  %v1094_v36 = vmul.f32 %v1286_v59, %v1030_v21 }
 0x1a4   :  { %v1093_v35 = vmul.f32 %v1288_v38, %v1029_v62 }
 0x1a5   :  { %1158 = vst.msk [vmem:[%s3277_s1 + $0x1e8] sm:$0xff] %vm72_vm0, %v1094_v36 }
 0x1a6   :  { %v1290_v19 = vpop.eup %1289  ;;  %1157 = vst.msk [vmem:[%s3277_s1 + $0x1e0] sm:$0xff] %vm72_vm0, %v1093_v35 }
 0x1a7   :  { %v1292_v10 = vpop.eup %1291  ;;  %v1096_v60 = vmul.f32 %v1290_v19, %v1032_v24 }
 0x1a8   :  { %v1095_v42 = vmul.f32 %v1292_v10, %v1031_v33 }
 0x1a9   :  { %1160 = vst.msk [vmem:[%s3277_s1 + $0x1f8] sm:$0xff] %vm72_vm0, %v1096_v60 }
 0x1aa   :  { %1159 = vst.msk [vmem:[%s3277_s1 + $0x1f0] sm:$0xff] %vm72_vm0, %v1095_v42 }

</bundles_post_ra>
